<compile_context>
chip_gen: v6e
topology: v6e:2x2x1
jax: 0.10.0
libtpu: 0.0.40
codegen_flags: <defaults>
</compile_context>

<pallas_src>
import functools

import jax
import jax.numpy as jnp
import numpy as np
from jax import lax
from jax.experimental import pallas as pl
from jax.experimental.pallas import tpu as pltpu

EP = 128  # lane-aligned width for the embedding / per-gate blocks


def decoder_kernel(
    z_ref, wp_ref, bp_ref,                 # latent projection (wp bf16, EP lanes)
    wih_ref, whh_ref, bih_ref, bhh_ref,    # GRU weights (L, EP, 3*EP) bf16, biases (L, 1, 3*EP) f32
    w1_ref, b1_ref,                        # MLP first linear (EP, H1) bf16, (1, H1) f32
    w2m_ref, b2m_ref,                      # folded w2 @ monomers.T: (H1, M) bf16, (1, M) f32
    msgs_ref,                              # (S*B, EP) f32 teacher-forcing inputs (row block s = msg for step s)
    targets_ref, mask_ref,                 # (S*B, 1) int32, (S*B, 1) f32
    decoded_ref, loss_ref,                 # outputs: (S*B, 1) int32, (1, 1) f32
    *, num_layers, max_steps, batch, num_monomers,
):
    f32 = jnp.float32
    bf16 = jnp.bfloat16
    G = 3 * EP

    def mm(a, b):
        # bf16 MXU inputs, f32 accumulation.
        return jnp.dot(a.astype(bf16), b, preferred_element_type=f32)

    # ---- prologue ----
    hidden0 = mm(z_ref[...], wp_ref[...]) + bp_ref[...]              # (B, EP)
    h = [hidden0] * num_layers

    # Hoisted bias broadcasts (re-used across the static unroll).
    bih_b = [jnp.broadcast_to(bih_ref[l], (batch, G)) for l in range(num_layers)]
    bhh_b = [jnp.broadcast_to(bhh_ref[l], (batch, G)) for l in range(num_layers)]

    # Layer-0 input matmul batched over all steps (messages depend only on targets).
    gx0_all = mm(msgs_ref[...], wih_ref[0]) + bih_ref[0]             # (S*B, 3*EP)

    # ---- serial GRU recurrence: only 2 matmuls per layer per step on the chain ----
    xs = []
    x = hidden0  # placeholder; layer 0 never reads it
    for s in range(max_steps):                                       # static unroll
        for l in range(num_layers):
            h_prev = h[l]
            if l == 0:
                gx = gx0_all[s * batch:(s + 1) * batch]              # sublane-aligned slice
            else:
                gx = mm(x, wih_ref[l]) + bih_b[l]
            gh = mm(h_prev, whh_ref[l]) + bhh_b[l]
            # 128-lane-aligned gate blocks -> whole-vreg slices (no XLU rotates).
            r = jax.nn.sigmoid(gx[:, :EP] + gh[:, :EP])
            u = jax.nn.sigmoid(gx[:, EP:2 * EP] + gh[:, EP:2 * EP])
            n = jnp.tanh(gx[:, 2 * EP:] + r * gh[:, 2 * EP:])
            h_new = (1.0 - u) * n + u * h_prev
            h[l] = h_new
            x = h_new
        xs.append(x)

    # ---- batched epilogue: MLP + folded monomer logits + argmax + masked CE ----
    xs_all = jnp.concatenate(xs, axis=0)                             # (S*B, EP)
    y1 = jnp.maximum(mm(xs_all, w1_ref[...]) + b1_ref[...], 0.0)     # (S*B, H1)
    logits = mm(y1, w2m_ref[...]) + b2m_ref[...]                     # (S*B, M)

    col_m = lax.broadcasted_iota(jnp.int32, logits.shape, 1)
    maxv = jnp.max(logits, axis=-1, keepdims=True)                   # (S*B, 1)
    amax = jnp.min(jnp.where(logits == maxv, col_m, num_monomers),
                   axis=-1, keepdims=True)                           # first-max semantics
    decoded_ref[...] = amax

    tgt = targets_ref[...]                                           # (S*B, 1)
    oh = col_m == tgt
    lse = maxv + jnp.log(jnp.sum(jnp.exp(logits - maxv), axis=-1, keepdims=True))
    logit_t = jnp.sum(jnp.where(oh, logits, 0.0), axis=-1, keepdims=True)
    ce = (lse - logit_t) * mask_ref[...]
    loss_ref[...] = jnp.zeros((1, 1), f32) + jnp.sum(ce) / f32(batch)


def decoder_forward(z, monomers, params, targets, mask, *, num_layers, max_steps):
    B, latent = z.shape
    M, E = monomers.shape
    H1 = params["w1"].shape[1]
    S = max_steps
    L = num_layers
    bf16 = jnp.bfloat16
    f32 = jnp.float32

    def pad_last(a, width):
        return jnp.pad(a, [(0, 0)] * (a.ndim - 1) + [(0, width - a.shape[-1])])

    # ---- host-side weight packing (lane-aligned gates, w2 folded into monomers.T) ----
    wp_p = pad_last(params["wp"].astype(f32), EP).astype(bf16)        # (latent, EP)
    bp_p = pad_last(params["bp"].astype(f32), EP)                     # (1, EP)

    def pack_gru_w(w):   # (L, E, 3E) -> (L, EP, 3*EP), each gate its own 128-lane block
        wg = w.reshape(L, E, 3, E)
        wg = jnp.pad(wg, ((0, 0), (0, EP - E), (0, 0), (0, EP - E)))
        return wg.reshape(L, EP, 3 * EP)

    def pack_gru_b(b):   # (L, 1, 3E) -> (L, 1, 3*EP)
        bg = b.reshape(L, 1, 3, E)
        bg = jnp.pad(bg, ((0, 0), (0, 0), (0, 0), (0, EP - E)))
        return bg.reshape(L, 1, 3 * EP)

    wih_p = pack_gru_w(params["wih"].astype(f32)).astype(bf16)
    whh_p = pack_gru_w(params["whh"].astype(f32)).astype(bf16)
    bih_p = pack_gru_b(params["bih"].astype(f32))
    bhh_p = pack_gru_b(params["bhh"].astype(f32))

    w1_p = jnp.pad(params["w1"].astype(f32), ((0, EP - E), (0, 0))).astype(bf16)  # (EP, H1)
    b1 = params["b1"].astype(f32)                                                 # (1, H1)

    # Fold the second MLP linear into the monomer dot product (fold in f32, then bf16).
    w2m = (params["w2"].astype(f32) @ monomers.astype(f32).T).astype(bf16)        # (H1, M)
    b2m = params["b2"].astype(f32) @ monomers.astype(f32).T                        # (1, M)

    # Teacher-forcing messages: step 0 = zeros, step s = monomers[targets[s-1]].
    msgs = monomers.astype(f32)[targets]                                           # (S, B, E)
    msgs = jnp.concatenate([jnp.zeros((1, B, E), f32), msgs[:-1]], axis=0)
    msgs = pad_last(msgs, EP).reshape(S * B, EP)

    targets_flat = targets.astype(jnp.int32).reshape(S * B, 1)
    mask_flat = mask.astype(f32).reshape(S * B, 1)

    kernel = functools.partial(decoder_kernel, num_layers=L, max_steps=S,
                               batch=B, num_monomers=M)

    vmem = pl.BlockSpec(memory_space=pltpu.MemorySpace.VMEM)
    decoded_flat, loss = pl.pallas_call(
        kernel,
        out_shape=(jax.ShapeDtypeStruct((S * B, 1), jnp.int32),
                   jax.ShapeDtypeStruct((1, 1), jnp.float32)),
        in_specs=[vmem] * 14,
        out_specs=(vmem, vmem),
    )(z.astype(f32), wp_p, bp_p, wih_p, whh_p, bih_p, bhh_p,
      w1_p, b1, w2m, b2m, msgs, targets_flat, mask_flat)

    decoded = decoded_flat.reshape(S, B).T                                         # (B, S)
    return loss[0, 0], decoded


def reference_forward(z, monomers, params, targets, mask, *, num_layers, max_steps):
    """Pure-JAX replica of the module (teacher_forcing=True, generate=False),
    same bf16-MXU/f32-accumulate numerics but the original (unfolded) op order."""
    bf16 = jnp.bfloat16

    def mm(a, b):
        return jnp.dot(a.astype(bf16), b.astype(bf16), preferred_element_type=jnp.float32)

    E = monomers.shape[1]
    B = z.shape[0]

    hidden = mm(z, params["wp"]) + params["bp"]
    h = [hidden] * num_layers
    msg = jnp.zeros_like(hidden)
    loss = jnp.float32(0.0)
    decoded, logits_all = [], []
    for s in range(max_steps):
        x = msg
        for l in range(num_layers):
            hp = h[l]
            gx = mm(x, params["wih"][l]) + params["bih"][l]
            gh = mm(hp, params["whh"][l]) + params["bhh"][l]
            r = jax.nn.sigmoid(gx[:, :E] + gh[:, :E])
            u = jax.nn.sigmoid(gx[:, E:2 * E] + gh[:, E:2 * E])
            n = jnp.tanh(gx[:, 2 * E:] + r * gh[:, 2 * E:])
            hn = (1.0 - u) * n + u * hp
            h[l] = hn
            x = hn
        y = jnp.maximum(mm(x, params["w1"]) + params["b1"], 0.0)
        y = mm(y, params["w2"]) + params["b2"]
        logits = mm(y, monomers.T)
        logits_all.append(logits)
        decoded.append(jnp.argmax(logits, axis=-1).astype(jnp.int32))
        t = targets[s]
        lse = jax.scipy.special.logsumexp(logits, axis=-1)
        logit_t = jnp.take_along_axis(logits, t[:, None], axis=-1)[:, 0]
        loss = loss + jnp.sum((lse - logit_t) * mask[s])
        msg = monomers[t]                        # teacher forcing: exact gather, as in the module
    return loss / B, jnp.stack(decoded, axis=1), jnp.stack(logits_all, axis=0)


if __name__ == "__main__":
    B = 8        # batch of z samples
    LATENT = 16  # latent_dimension
    E = 32       # graph_embedding_dim
    L = 2        # number_of_layers
    S = 4        # max_steps
    M = 16       # number of monomer embeddings
    H1 = 64      # gru_neural_net_hidden_dim = [64]

    key = jax.random.PRNGKey(0)
    keys = jax.random.split(key, 12)
    sc = 0.2
    params = dict(
        wp=jax.random.normal(keys[0], (LATENT, E), jnp.float32) * sc,
        bp=jax.random.normal(keys[1], (1, E), jnp.float32) * sc,
        wih=jax.random.normal(keys[2], (L, E, 3 * E), jnp.float32) * sc,
        whh=jax.random.normal(keys[3], (L, E, 3 * E), jnp.float32) * sc,
        bih=jax.random.normal(keys[4], (L, 1, 3 * E), jnp.float32) * sc,
        bhh=jax.random.normal(keys[5], (L, 1, 3 * E), jnp.float32) * sc,
        w1=jax.random.normal(keys[6], (E, H1), jnp.float32) * sc,
        b1=jax.random.normal(keys[7], (1, H1), jnp.float32) * sc,
        w2=jax.random.normal(keys[8], (H1, E), jnp.float32) * sc,
        b2=jax.random.normal(keys[9], (1, E), jnp.float32) * sc,
    )
    z = jax.random.normal(keys[10], (B, LATENT), jnp.float32)
    monomers = jax.random.normal(keys[11], (M, E), jnp.float32) * sc

    # Synthetic answer_dict / monomer_bag_idx (teacher_forcing=True, generate=False).
    rng = np.random.RandomState(0)
    monomer_bag_idx = list(range(B))
    answer_dict = {b: [int(v) for v in rng.randint(0, M, size=rng.randint(1, S + 1))]
                   for b in monomer_bag_idx}

    # Host-side emulation of the PyTorch python bookkeeping: int targets + ~stop_flag mask.
    lengths = np.array([len(answer_dict[b]) for b in monomer_bag_idx])
    targets = np.zeros((S, B), np.int32)
    mask = np.zeros((S, B), np.float32)
    stop = np.zeros(B, bool)
    for s in range(S):
        for i, b in enumerate(monomer_bag_idx):
            idx_step = min(s, lengths[i] - 1)
            targets[s, i] = answer_dict[b][idx_step]
            mask[s, i] = 0.0 if stop[i] else 1.0
        stop[lengths == s + 1] = True

    targets_j = jnp.asarray(targets)
    mask_j = jnp.asarray(mask)

    loss, decoded = decoder_forward(z, monomers, params, targets_j, mask_j,
                                    num_layers=L, max_steps=S)
    jax.block_until_ready((loss, decoded))

    loss_ref, decoded_ref, logits_ref = reference_forward(
        z, monomers, params, targets_j, mask_j, num_layers=L, max_steps=S)

    loss_np, loss_ref_np = float(loss), float(loss_ref)
    assert np.allclose(loss_np, loss_ref_np, rtol=2e-2, atol=2e-2), (loss_np, loss_ref_np)

    dec_k = np.asarray(decoded)
    dec_r = np.asarray(decoded_ref)
    lg = np.asarray(logits_ref)                                      # (S, B, M)
    if not np.array_equal(dec_k, dec_r):
        # Tolerate argmax differences only where the reference logits are numerically tied.
        bad_b, bad_s = np.nonzero(dec_k != dec_r)
        for bb, ss in zip(bad_b, bad_s):
            gap = abs(lg[ss, bb, dec_k[bb, ss]] - lg[ss, bb, dec_r[bb, ss]])
            assert gap < 5e-2, (int(bb), int(ss), float(gap))
    print("KERNEL_OK")
</pallas_src>

<mosaic_0001>
module attributes {stable_mosaic.version = 11 : i64} {
  func.func @decoder_kernel(%arg0: memref<8x16xf32, #tpu.memory_space<vmem>>, %arg1: memref<16x128xbf16, #tpu.memory_space<vmem>>, %arg2: memref<1x128xf32, #tpu.memory_space<vmem>>, %arg3: memref<2x128x384xbf16, #tpu.memory_space<vmem>>, %arg4: memref<2x128x384xbf16, #tpu.memory_space<vmem>>, %arg5: memref<2x1x384xf32, #tpu.memory_space<vmem>>, %arg6: memref<2x1x384xf32, #tpu.memory_space<vmem>>, %arg7: memref<128x64xbf16, #tpu.memory_space<vmem>>, %arg8: memref<1x64xf32, #tpu.memory_space<vmem>>, %arg9: memref<64x16xbf16, #tpu.memory_space<vmem>>, %arg10: memref<1x16xf32, #tpu.memory_space<vmem>>, %arg11: memref<32x128xf32, #tpu.memory_space<vmem>>, %arg12: memref<32x1xi32, #tpu.memory_space<vmem>>, %arg13: memref<32x1xf32, #tpu.memory_space<vmem>>, %arg14: memref<32x1xi32, #tpu.memory_space<vmem>>, %arg15: memref<1x1xf32, #tpu.memory_space<vmem>>) attributes {dimension_semantics = [], scalar_prefetch = 0 : i64, scratch_operands = 0 : i64, tpu.core_type = #tpu.core_type<tc>} {
    %c0 = arith.constant 0 : index
    %c0_0 = arith.constant 0 : index
    %0 = vector.load %arg0[%c0, %c0_0] : memref<8x16xf32, #tpu.memory_space<vmem>>, vector<8x16xf32>
    %c0_1 = arith.constant 0 : index
    %c0_2 = arith.constant 0 : index
    %1 = vector.load %arg1[%c0_1, %c0_2] : memref<16x128xbf16, #tpu.memory_space<vmem>>, vector<16x128xbf16>
    %2 = arith.truncf %0 : vector<8x16xf32> to vector<8x16xbf16>
    %cst = arith.constant dense<0.000000e+00> : vector<8x128xf32>
    %3 = tpu.matmul %2, %1, %cst {dimension_numbers = #tpu.dot_dimension_numbers<[1], [0], [0], [1], [0, 0, 1, 1], [], []>} : vector<8x16xbf16>, vector<16x128xbf16>, vector<8x128xf32> -> vector<8x128xf32>
    %c0_3 = arith.constant 0 : index
    %c0_4 = arith.constant 0 : index
    %4 = vector.load %arg2[%c0_3, %c0_4] : memref<1x128xf32, #tpu.memory_space<vmem>>, vector<1x128xf32>
    %5 = vector.broadcast %4 : vector<1x128xf32> to vector<8x128xf32>
    %6 = arith.addf %3, %5 : vector<8x128xf32>
    %c1 = arith.constant 1 : index
    %c0_5 = arith.constant 0 : index
    %c0_6 = arith.constant 0 : index
    %7 = vector.load %arg5[%c1, %c0_5, %c0_6] : memref<2x1x384xf32, #tpu.memory_space<vmem>>, vector<1x1x384xf32>
    %8 = vector.shape_cast %7 : vector<1x1x384xf32> to vector<1x384xf32>
    %9 = vector.shape_cast %8 : vector<1x384xf32> to vector<1x384xf32>
    %10 = vector.broadcast %9 : vector<1x384xf32> to vector<8x384xf32>
    %c0_7 = arith.constant 0 : index
    %c0_8 = arith.constant 0 : index
    %c0_9 = arith.constant 0 : index
    %11 = vector.load %arg6[%c0_7, %c0_8, %c0_9] : memref<2x1x384xf32, #tpu.memory_space<vmem>>, vector<1x1x384xf32>
    %12 = vector.shape_cast %11 : vector<1x1x384xf32> to vector<1x384xf32>
    %13 = vector.shape_cast %12 : vector<1x384xf32> to vector<1x384xf32>
    %14 = vector.broadcast %13 : vector<1x384xf32> to vector<8x384xf32>
    %c1_10 = arith.constant 1 : index
    %c0_11 = arith.constant 0 : index
    %c0_12 = arith.constant 0 : index
    %15 = vector.load %arg6[%c1_10, %c0_11, %c0_12] : memref<2x1x384xf32, #tpu.memory_space<vmem>>, vector<1x1x384xf32>
    %16 = vector.shape_cast %15 : vector<1x1x384xf32> to vector<1x384xf32>
    %17 = vector.shape_cast %16 : vector<1x384xf32> to vector<1x384xf32>
    %18 = vector.broadcast %17 : vector<1x384xf32> to vector<8x384xf32>
    %c0_13 = arith.constant 0 : index
    %c0_14 = arith.constant 0 : index
    %19 = vector.load %arg11[%c0_13, %c0_14] : memref<32x128xf32, #tpu.memory_space<vmem>>, vector<32x128xf32>
    %c0_15 = arith.constant 0 : index
    %c0_16 = arith.constant 0 : index
    %c0_17 = arith.constant 0 : index
    %20 = vector.load %arg3[%c0_15, %c0_16, %c0_17] : memref<2x128x384xbf16, #tpu.memory_space<vmem>>, vector<1x128x384xbf16>
    %21 = vector.shape_cast %20 : vector<1x128x384xbf16> to vector<128x384xbf16>
    %22 = arith.truncf %19 : vector<32x128xf32> to vector<32x128xbf16>
    %cst_18 = arith.constant dense<0.000000e+00> : vector<32x384xf32>
    %23 = tpu.matmul %22, %21, %cst_18 {dimension_numbers = #tpu.dot_dimension_numbers<[1], [0], [0], [1], [0, 0, 1, 1], [], []>} : vector<32x128xbf16>, vector<128x384xbf16>, vector<32x384xf32> -> vector<32x384xf32>
    %c0_19 = arith.constant 0 : index
    %c0_20 = arith.constant 0 : index
    %c0_21 = arith.constant 0 : index
    %24 = vector.load %arg5[%c0_19, %c0_20, %c0_21] : memref<2x1x384xf32, #tpu.memory_space<vmem>>, vector<1x1x384xf32>
    %25 = vector.shape_cast %24 : vector<1x1x384xf32> to vector<1x384xf32>
    %26 = vector.broadcast %25 : vector<1x384xf32> to vector<32x384xf32>
    %27 = arith.addf %23, %26 : vector<32x384xf32>
    %28 = vector.extract_strided_slice %27 {offsets = [0, 0], sizes = [8, 384], strides = [1, 1]} : vector<32x384xf32> to vector<8x384xf32>
    %c0_22 = arith.constant 0 : index
    %c0_23 = arith.constant 0 : index
    %c0_24 = arith.constant 0 : index
    %29 = vector.load %arg4[%c0_22, %c0_23, %c0_24] : memref<2x128x384xbf16, #tpu.memory_space<vmem>>, vector<1x128x384xbf16>
    %30 = vector.shape_cast %29 : vector<1x128x384xbf16> to vector<128x384xbf16>
    %31 = arith.truncf %6 : vector<8x128xf32> to vector<8x128xbf16>
    %cst_25 = arith.constant dense<0.000000e+00> : vector<8x384xf32>
    %32 = tpu.matmul %31, %30, %cst_25 {dimension_numbers = #tpu.dot_dimension_numbers<[1], [0], [0], [1], [0, 0, 1, 1], [], []>} : vector<8x128xbf16>, vector<128x384xbf16>, vector<8x384xf32> -> vector<8x384xf32>
    %33 = arith.addf %32, %14 : vector<8x384xf32>
    %34 = vector.extract_strided_slice %28 {offsets = [0, 0], sizes = [8, 128], strides = [1, 1]} : vector<8x384xf32> to vector<8x128xf32>
    %35 = vector.extract_strided_slice %33 {offsets = [0, 0], sizes = [8, 128], strides = [1, 1]} : vector<8x384xf32> to vector<8x128xf32>
    %36 = arith.addf %34, %35 : vector<8x128xf32>
    %37 = arith.negf %36 : vector<8x128xf32>
    %38 = math.exp %37 : vector<8x128xf32>
    %cst_26 = arith.constant 1.000000e+00 : f32
    %39 = vector.broadcast %cst_26 : f32 to vector<8x128xf32>
    %40 = arith.addf %39, %38 : vector<8x128xf32>
    %41 = arith.divf %39, %40 : vector<8x128xf32>
    %42 = vector.extract_strided_slice %28 {offsets = [0, 128], sizes = [8, 128], strides = [1, 1]} : vector<8x384xf32> to vector<8x128xf32>
    %43 = vector.extract_strided_slice %33 {offsets = [0, 128], sizes = [8, 128], strides = [1, 1]} : vector<8x384xf32> to vector<8x128xf32>
    %44 = arith.addf %42, %43 : vector<8x128xf32>
    %45 = arith.negf %44 : vector<8x128xf32>
    %46 = math.exp %45 : vector<8x128xf32>
    %cst_27 = arith.constant 1.000000e+00 : f32
    %47 = vector.broadcast %cst_27 : f32 to vector<8x128xf32>
    %48 = arith.addf %47, %46 : vector<8x128xf32>
    %49 = arith.divf %47, %48 : vector<8x128xf32>
    %50 = vector.extract_strided_slice %28 {offsets = [0, 256], sizes = [8, 128], strides = [1, 1]} : vector<8x384xf32> to vector<8x128xf32>
    %51 = vector.extract_strided_slice %33 {offsets = [0, 256], sizes = [8, 128], strides = [1, 1]} : vector<8x384xf32> to vector<8x128xf32>
    %52 = arith.mulf %41, %51 : vector<8x128xf32>
    %53 = arith.addf %50, %52 : vector<8x128xf32>
    %54 = math.tanh %53 : vector<8x128xf32>
    %cst_28 = arith.constant 1.000000e+00 : f32
    %55 = vector.broadcast %cst_28 : f32 to vector<8x128xf32>
    %56 = arith.subf %55, %49 : vector<8x128xf32>
    %57 = arith.mulf %56, %54 : vector<8x128xf32>
    %58 = arith.mulf %49, %6 : vector<8x128xf32>
    %59 = arith.addf %57, %58 : vector<8x128xf32>
    %c1_29 = arith.constant 1 : index
    %c0_30 = arith.constant 0 : index
    %c0_31 = arith.constant 0 : index
    %60 = vector.load %arg3[%c1_29, %c0_30, %c0_31] : memref<2x128x384xbf16, #tpu.memory_space<vmem>>, vector<1x128x384xbf16>
    %61 = vector.shape_cast %60 : vector<1x128x384xbf16> to vector<128x384xbf16>
    %62 = arith.truncf %59 : vector<8x128xf32> to vector<8x128xbf16>
    %cst_32 = arith.constant dense<0.000000e+00> : vector<8x384xf32>
    %63 = tpu.matmul %62, %61, %cst_32 {dimension_numbers = #tpu.dot_dimension_numbers<[1], [0], [0], [1], [0, 0, 1, 1], [], []>} : vector<8x128xbf16>, vector<128x384xbf16>, vector<8x384xf32> -> vector<8x384xf32>
    %64 = arith.addf %63, %10 : vector<8x384xf32>
    %c1_33 = arith.constant 1 : index
    %c0_34 = arith.constant 0 : index
    %c0_35 = arith.constant 0 : index
    %65 = vector.load %arg4[%c1_33, %c0_34, %c0_35] : memref<2x128x384xbf16, #tpu.memory_space<vmem>>, vector<1x128x384xbf16>
    %66 = vector.shape_cast %65 : vector<1x128x384xbf16> to vector<128x384xbf16>
    %67 = arith.truncf %6 : vector<8x128xf32> to vector<8x128xbf16>
    %cst_36 = arith.constant dense<0.000000e+00> : vector<8x384xf32>
    %68 = tpu.matmul %67, %66, %cst_36 {dimension_numbers = #tpu.dot_dimension_numbers<[1], [0], [0], [1], [0, 0, 1, 1], [], []>} : vector<8x128xbf16>, vector<128x384xbf16>, vector<8x384xf32> -> vector<8x384xf32>
    %69 = arith.addf %68, %18 : vector<8x384xf32>
    %70 = vector.extract_strided_slice %64 {offsets = [0, 0], sizes = [8, 128], strides = [1, 1]} : vector<8x384xf32> to vector<8x128xf32>
    %71 = vector.extract_strided_slice %69 {offsets = [0, 0], sizes = [8, 128], strides = [1, 1]} : vector<8x384xf32> to vector<8x128xf32>
    %72 = arith.addf %70, %71 : vector<8x128xf32>
    %73 = arith.negf %72 : vector<8x128xf32>
    %74 = math.exp %73 : vector<8x128xf32>
    %cst_37 = arith.constant 1.000000e+00 : f32
    %75 = vector.broadcast %cst_37 : f32 to vector<8x128xf32>
    %76 = arith.addf %75, %74 : vector<8x128xf32>
    %77 = arith.divf %75, %76 : vector<8x128xf32>
    %78 = vector.extract_strided_slice %64 {offsets = [0, 128], sizes = [8, 128], strides = [1, 1]} : vector<8x384xf32> to vector<8x128xf32>
    %79 = vector.extract_strided_slice %69 {offsets = [0, 128], sizes = [8, 128], strides = [1, 1]} : vector<8x384xf32> to vector<8x128xf32>
    %80 = arith.addf %78, %79 : vector<8x128xf32>
    %81 = arith.negf %80 : vector<8x128xf32>
    %82 = math.exp %81 : vector<8x128xf32>
    %cst_38 = arith.constant 1.000000e+00 : f32
    %83 = vector.broadcast %cst_38 : f32 to vector<8x128xf32>
    %84 = arith.addf %83, %82 : vector<8x128xf32>
    %85 = arith.divf %83, %84 : vector<8x128xf32>
    %86 = vector.extract_strided_slice %64 {offsets = [0, 256], sizes = [8, 128], strides = [1, 1]} : vector<8x384xf32> to vector<8x128xf32>
    %87 = vector.extract_strided_slice %69 {offsets = [0, 256], sizes = [8, 128], strides = [1, 1]} : vector<8x384xf32> to vector<8x128xf32>
    %88 = arith.mulf %77, %87 : vector<8x128xf32>
    %89 = arith.addf %86, %88 : vector<8x128xf32>
    %90 = math.tanh %89 : vector<8x128xf32>
    %cst_39 = arith.constant 1.000000e+00 : f32
    %91 = vector.broadcast %cst_39 : f32 to vector<8x128xf32>
    %92 = arith.subf %91, %85 : vector<8x128xf32>
    %93 = arith.mulf %92, %90 : vector<8x128xf32>
    %94 = arith.mulf %85, %6 : vector<8x128xf32>
    %95 = arith.addf %93, %94 : vector<8x128xf32>
    %96 = vector.extract_strided_slice %27 {offsets = [8, 0], sizes = [8, 384], strides = [1, 1]} : vector<32x384xf32> to vector<8x384xf32>
    %c0_40 = arith.constant 0 : index
    %c0_41 = arith.constant 0 : index
    %c0_42 = arith.constant 0 : index
    %97 = vector.load %arg4[%c0_40, %c0_41, %c0_42] : memref<2x128x384xbf16, #tpu.memory_space<vmem>>, vector<1x128x384xbf16>
    %98 = vector.shape_cast %97 : vector<1x128x384xbf16> to vector<128x384xbf16>
    %99 = arith.truncf %59 : vector<8x128xf32> to vector<8x128xbf16>
    %cst_43 = arith.constant dense<0.000000e+00> : vector<8x384xf32>
    %100 = tpu.matmul %99, %98, %cst_43 {dimension_numbers = #tpu.dot_dimension_numbers<[1], [0], [0], [1], [0, 0, 1, 1], [], []>} : vector<8x128xbf16>, vector<128x384xbf16>, vector<8x384xf32> -> vector<8x384xf32>
    %101 = arith.addf %100, %14 : vector<8x384xf32>
    %102 = vector.extract_strided_slice %96 {offsets = [0, 0], sizes = [8, 128], strides = [1, 1]} : vector<8x384xf32> to vector<8x128xf32>
    %103 = vector.extract_strided_slice %101 {offsets = [0, 0], sizes = [8, 128], strides = [1, 1]} : vector<8x384xf32> to vector<8x128xf32>
    %104 = arith.addf %102, %103 : vector<8x128xf32>
    %105 = arith.negf %104 : vector<8x128xf32>
    %106 = math.exp %105 : vector<8x128xf32>
    %cst_44 = arith.constant 1.000000e+00 : f32
    %107 = vector.broadcast %cst_44 : f32 to vector<8x128xf32>
    %108 = arith.addf %107, %106 : vector<8x128xf32>
    %109 = arith.divf %107, %108 : vector<8x128xf32>
    %110 = vector.extract_strided_slice %96 {offsets = [0, 128], sizes = [8, 128], strides = [1, 1]} : vector<8x384xf32> to vector<8x128xf32>
    %111 = vector.extract_strided_slice %101 {offsets = [0, 128], sizes = [8, 128], strides = [1, 1]} : vector<8x384xf32> to vector<8x128xf32>
    %112 = arith.addf %110, %111 : vector<8x128xf32>
    %113 = arith.negf %112 : vector<8x128xf32>
    %114 = math.exp %113 : vector<8x128xf32>
    %cst_45 = arith.constant 1.000000e+00 : f32
    %115 = vector.broadcast %cst_45 : f32 to vector<8x128xf32>
    %116 = arith.addf %115, %114 : vector<8x128xf32>
    %117 = arith.divf %115, %116 : vector<8x128xf32>
    %118 = vector.extract_strided_slice %96 {offsets = [0, 256], sizes = [8, 128], strides = [1, 1]} : vector<8x384xf32> to vector<8x128xf32>
    %119 = vector.extract_strided_slice %101 {offsets = [0, 256], sizes = [8, 128], strides = [1, 1]} : vector<8x384xf32> to vector<8x128xf32>
    %120 = arith.mulf %109, %119 : vector<8x128xf32>
    %121 = arith.addf %118, %120 : vector<8x128xf32>
    %122 = math.tanh %121 : vector<8x128xf32>
    %cst_46 = arith.constant 1.000000e+00 : f32
    %123 = vector.broadcast %cst_46 : f32 to vector<8x128xf32>
    %124 = arith.subf %123, %117 : vector<8x128xf32>
    %125 = arith.mulf %124, %122 : vector<8x128xf32>
    %126 = arith.mulf %117, %59 : vector<8x128xf32>
    %127 = arith.addf %125, %126 : vector<8x128xf32>
    %c1_47 = arith.constant 1 : index
    %c0_48 = arith.constant 0 : index
    %c0_49 = arith.constant 0 : index
    %128 = vector.load %arg3[%c1_47, %c0_48, %c0_49] : memref<2x128x384xbf16, #tpu.memory_space<vmem>>, vector<1x128x384xbf16>
    %129 = vector.shape_cast %128 : vector<1x128x384xbf16> to vector<128x384xbf16>
    %130 = arith.truncf %127 : vector<8x128xf32> to vector<8x128xbf16>
    %cst_50 = arith.constant dense<0.000000e+00> : vector<8x384xf32>
    %131 = tpu.matmul %130, %129, %cst_50 {dimension_numbers = #tpu.dot_dimension_numbers<[1], [0], [0], [1], [0, 0, 1, 1], [], []>} : vector<8x128xbf16>, vector<128x384xbf16>, vector<8x384xf32> -> vector<8x384xf32>
    %132 = arith.addf %131, %10 : vector<8x384xf32>
    %c1_51 = arith.constant 1 : index
    %c0_52 = arith.constant 0 : index
    %c0_53 = arith.constant 0 : index
    %133 = vector.load %arg4[%c1_51, %c0_52, %c0_53] : memref<2x128x384xbf16, #tpu.memory_space<vmem>>, vector<1x128x384xbf16>
    %134 = vector.shape_cast %133 : vector<1x128x384xbf16> to vector<128x384xbf16>
    %135 = arith.truncf %95 : vector<8x128xf32> to vector<8x128xbf16>
    %cst_54 = arith.constant dense<0.000000e+00> : vector<8x384xf32>
    %136 = tpu.matmul %135, %134, %cst_54 {dimension_numbers = #tpu.dot_dimension_numbers<[1], [0], [0], [1], [0, 0, 1, 1], [], []>} : vector<8x128xbf16>, vector<128x384xbf16>, vector<8x384xf32> -> vector<8x384xf32>
    %137 = arith.addf %136, %18 : vector<8x384xf32>
    %138 = vector.extract_strided_slice %132 {offsets = [0, 0], sizes = [8, 128], strides = [1, 1]} : vector<8x384xf32> to vector<8x128xf32>
    %139 = vector.extract_strided_slice %137 {offsets = [0, 0], sizes = [8, 128], strides = [1, 1]} : vector<8x384xf32> to vector<8x128xf32>
    %140 = arith.addf %138, %139 : vector<8x128xf32>
    %141 = arith.negf %140 : vector<8x128xf32>
    %142 = math.exp %141 : vector<8x128xf32>
    %cst_55 = arith.constant 1.000000e+00 : f32
    %143 = vector.broadcast %cst_55 : f32 to vector<8x128xf32>
    %144 = arith.addf %143, %142 : vector<8x128xf32>
    %145 = arith.divf %143, %144 : vector<8x128xf32>
    %146 = vector.extract_strided_slice %132 {offsets = [0, 128], sizes = [8, 128], strides = [1, 1]} : vector<8x384xf32> to vector<8x128xf32>
    %147 = vector.extract_strided_slice %137 {offsets = [0, 128], sizes = [8, 128], strides = [1, 1]} : vector<8x384xf32> to vector<8x128xf32>
    %148 = arith.addf %146, %147 : vector<8x128xf32>
    %149 = arith.negf %148 : vector<8x128xf32>
    %150 = math.exp %149 : vector<8x128xf32>
    %cst_56 = arith.constant 1.000000e+00 : f32
    %151 = vector.broadcast %cst_56 : f32 to vector<8x128xf32>
    %152 = arith.addf %151, %150 : vector<8x128xf32>
    %153 = arith.divf %151, %152 : vector<8x128xf32>
    %154 = vector.extract_strided_slice %132 {offsets = [0, 256], sizes = [8, 128], strides = [1, 1]} : vector<8x384xf32> to vector<8x128xf32>
    %155 = vector.extract_strided_slice %137 {offsets = [0, 256], sizes = [8, 128], strides = [1, 1]} : vector<8x384xf32> to vector<8x128xf32>
    %156 = arith.mulf %145, %155 : vector<8x128xf32>
    %157 = arith.addf %154, %156 : vector<8x128xf32>
    %158 = math.tanh %157 : vector<8x128xf32>
    %cst_57 = arith.constant 1.000000e+00 : f32
    %159 = vector.broadcast %cst_57 : f32 to vector<8x128xf32>
    %160 = arith.subf %159, %153 : vector<8x128xf32>
    %161 = arith.mulf %160, %158 : vector<8x128xf32>
    %162 = arith.mulf %153, %95 : vector<8x128xf32>
    %163 = arith.addf %161, %162 : vector<8x128xf32>
    %164 = vector.extract_strided_slice %27 {offsets = [16, 0], sizes = [8, 384], strides = [1, 1]} : vector<32x384xf32> to vector<8x384xf32>
    %c0_58 = arith.constant 0 : index
    %c0_59 = arith.constant 0 : index
    %c0_60 = arith.constant 0 : index
    %165 = vector.load %arg4[%c0_58, %c0_59, %c0_60] : memref<2x128x384xbf16, #tpu.memory_space<vmem>>, vector<1x128x384xbf16>
    %166 = vector.shape_cast %165 : vector<1x128x384xbf16> to vector<128x384xbf16>
    %167 = arith.truncf %127 : vector<8x128xf32> to vector<8x128xbf16>
    %cst_61 = arith.constant dense<0.000000e+00> : vector<8x384xf32>
    %168 = tpu.matmul %167, %166, %cst_61 {dimension_numbers = #tpu.dot_dimension_numbers<[1], [0], [0], [1], [0, 0, 1, 1], [], []>} : vector<8x128xbf16>, vector<128x384xbf16>, vector<8x384xf32> -> vector<8x384xf32>
    %169 = arith.addf %168, %14 : vector<8x384xf32>
    %170 = vector.extract_strided_slice %164 {offsets = [0, 0], sizes = [8, 128], strides = [1, 1]} : vector<8x384xf32> to vector<8x128xf32>
    %171 = vector.extract_strided_slice %169 {offsets = [0, 0], sizes = [8, 128], strides = [1, 1]} : vector<8x384xf32> to vector<8x128xf32>
    %172 = arith.addf %170, %171 : vector<8x128xf32>
    %173 = arith.negf %172 : vector<8x128xf32>
    %174 = math.exp %173 : vector<8x128xf32>
    %cst_62 = arith.constant 1.000000e+00 : f32
    %175 = vector.broadcast %cst_62 : f32 to vector<8x128xf32>
    %176 = arith.addf %175, %174 : vector<8x128xf32>
    %177 = arith.divf %175, %176 : vector<8x128xf32>
    %178 = vector.extract_strided_slice %164 {offsets = [0, 128], sizes = [8, 128], strides = [1, 1]} : vector<8x384xf32> to vector<8x128xf32>
    %179 = vector.extract_strided_slice %169 {offsets = [0, 128], sizes = [8, 128], strides = [1, 1]} : vector<8x384xf32> to vector<8x128xf32>
    %180 = arith.addf %178, %179 : vector<8x128xf32>
    %181 = arith.negf %180 : vector<8x128xf32>
    %182 = math.exp %181 : vector<8x128xf32>
    %cst_63 = arith.constant 1.000000e+00 : f32
    %183 = vector.broadcast %cst_63 : f32 to vector<8x128xf32>
    %184 = arith.addf %183, %182 : vector<8x128xf32>
    %185 = arith.divf %183, %184 : vector<8x128xf32>
    %186 = vector.extract_strided_slice %164 {offsets = [0, 256], sizes = [8, 128], strides = [1, 1]} : vector<8x384xf32> to vector<8x128xf32>
    %187 = vector.extract_strided_slice %169 {offsets = [0, 256], sizes = [8, 128], strides = [1, 1]} : vector<8x384xf32> to vector<8x128xf32>
    %188 = arith.mulf %177, %187 : vector<8x128xf32>
    %189 = arith.addf %186, %188 : vector<8x128xf32>
    %190 = math.tanh %189 : vector<8x128xf32>
    %cst_64 = arith.constant 1.000000e+00 : f32
    %191 = vector.broadcast %cst_64 : f32 to vector<8x128xf32>
    %192 = arith.subf %191, %185 : vector<8x128xf32>
    %193 = arith.mulf %192, %190 : vector<8x128xf32>
    %194 = arith.mulf %185, %127 : vector<8x128xf32>
    %195 = arith.addf %193, %194 : vector<8x128xf32>
    %c1_65 = arith.constant 1 : index
    %c0_66 = arith.constant 0 : index
    %c0_67 = arith.constant 0 : index
    %196 = vector.load %arg3[%c1_65, %c0_66, %c0_67] : memref<2x128x384xbf16, #tpu.memory_space<vmem>>, vector<1x128x384xbf16>
    %197 = vector.shape_cast %196 : vector<1x128x384xbf16> to vector<128x384xbf16>
    %198 = arith.truncf %195 : vector<8x128xf32> to vector<8x128xbf16>
    %cst_68 = arith.constant dense<0.000000e+00> : vector<8x384xf32>
    %199 = tpu.matmul %198, %197, %cst_68 {dimension_numbers = #tpu.dot_dimension_numbers<[1], [0], [0], [1], [0, 0, 1, 1], [], []>} : vector<8x128xbf16>, vector<128x384xbf16>, vector<8x384xf32> -> vector<8x384xf32>
    %200 = arith.addf %199, %10 : vector<8x384xf32>
    %c1_69 = arith.constant 1 : index
    %c0_70 = arith.constant 0 : index
    %c0_71 = arith.constant 0 : index
    %201 = vector.load %arg4[%c1_69, %c0_70, %c0_71] : memref<2x128x384xbf16, #tpu.memory_space<vmem>>, vector<1x128x384xbf16>
    %202 = vector.shape_cast %201 : vector<1x128x384xbf16> to vector<128x384xbf16>
    %203 = arith.truncf %163 : vector<8x128xf32> to vector<8x128xbf16>
    %cst_72 = arith.constant dense<0.000000e+00> : vector<8x384xf32>
    %204 = tpu.matmul %203, %202, %cst_72 {dimension_numbers = #tpu.dot_dimension_numbers<[1], [0], [0], [1], [0, 0, 1, 1], [], []>} : vector<8x128xbf16>, vector<128x384xbf16>, vector<8x384xf32> -> vector<8x384xf32>
    %205 = arith.addf %204, %18 : vector<8x384xf32>
    %206 = vector.extract_strided_slice %200 {offsets = [0, 0], sizes = [8, 128], strides = [1, 1]} : vector<8x384xf32> to vector<8x128xf32>
    %207 = vector.extract_strided_slice %205 {offsets = [0, 0], sizes = [8, 128], strides = [1, 1]} : vector<8x384xf32> to vector<8x128xf32>
    %208 = arith.addf %206, %207 : vector<8x128xf32>
    %209 = arith.negf %208 : vector<8x128xf32>
    %210 = math.exp %209 : vector<8x128xf32>
    %cst_73 = arith.constant 1.000000e+00 : f32
    %211 = vector.broadcast %cst_73 : f32 to vector<8x128xf32>
    %212 = arith.addf %211, %210 : vector<8x128xf32>
    %213 = arith.divf %211, %212 : vector<8x128xf32>
    %214 = vector.extract_strided_slice %200 {offsets = [0, 128], sizes = [8, 128], strides = [1, 1]} : vector<8x384xf32> to vector<8x128xf32>
    %215 = vector.extract_strided_slice %205 {offsets = [0, 128], sizes = [8, 128], strides = [1, 1]} : vector<8x384xf32> to vector<8x128xf32>
    %216 = arith.addf %214, %215 : vector<8x128xf32>
    %217 = arith.negf %216 : vector<8x128xf32>
    %218 = math.exp %217 : vector<8x128xf32>
    %cst_74 = arith.constant 1.000000e+00 : f32
    %219 = vector.broadcast %cst_74 : f32 to vector<8x128xf32>
    %220 = arith.addf %219, %218 : vector<8x128xf32>
    %221 = arith.divf %219, %220 : vector<8x128xf32>
    %222 = vector.extract_strided_slice %200 {offsets = [0, 256], sizes = [8, 128], strides = [1, 1]} : vector<8x384xf32> to vector<8x128xf32>
    %223 = vector.extract_strided_slice %205 {offsets = [0, 256], sizes = [8, 128], strides = [1, 1]} : vector<8x384xf32> to vector<8x128xf32>
    %224 = arith.mulf %213, %223 : vector<8x128xf32>
    %225 = arith.addf %222, %224 : vector<8x128xf32>
    %226 = math.tanh %225 : vector<8x128xf32>
    %cst_75 = arith.constant 1.000000e+00 : f32
    %227 = vector.broadcast %cst_75 : f32 to vector<8x128xf32>
    %228 = arith.subf %227, %221 : vector<8x128xf32>
    %229 = arith.mulf %228, %226 : vector<8x128xf32>
    %230 = arith.mulf %221, %163 : vector<8x128xf32>
    %231 = arith.addf %229, %230 : vector<8x128xf32>
    %232 = vector.extract_strided_slice %27 {offsets = [24, 0], sizes = [8, 384], strides = [1, 1]} : vector<32x384xf32> to vector<8x384xf32>
    %c0_76 = arith.constant 0 : index
    %c0_77 = arith.constant 0 : index
    %c0_78 = arith.constant 0 : index
    %233 = vector.load %arg4[%c0_76, %c0_77, %c0_78] : memref<2x128x384xbf16, #tpu.memory_space<vmem>>, vector<1x128x384xbf16>
    %234 = vector.shape_cast %233 : vector<1x128x384xbf16> to vector<128x384xbf16>
    %235 = arith.truncf %195 : vector<8x128xf32> to vector<8x128xbf16>
    %cst_79 = arith.constant dense<0.000000e+00> : vector<8x384xf32>
    %236 = tpu.matmul %235, %234, %cst_79 {dimension_numbers = #tpu.dot_dimension_numbers<[1], [0], [0], [1], [0, 0, 1, 1], [], []>} : vector<8x128xbf16>, vector<128x384xbf16>, vector<8x384xf32> -> vector<8x384xf32>
    %237 = arith.addf %236, %14 : vector<8x384xf32>
    %238 = vector.extract_strided_slice %232 {offsets = [0, 0], sizes = [8, 128], strides = [1, 1]} : vector<8x384xf32> to vector<8x128xf32>
    %239 = vector.extract_strided_slice %237 {offsets = [0, 0], sizes = [8, 128], strides = [1, 1]} : vector<8x384xf32> to vector<8x128xf32>
    %240 = arith.addf %238, %239 : vector<8x128xf32>
    %241 = arith.negf %240 : vector<8x128xf32>
    %242 = math.exp %241 : vector<8x128xf32>
    %cst_80 = arith.constant 1.000000e+00 : f32
    %243 = vector.broadcast %cst_80 : f32 to vector<8x128xf32>
    %244 = arith.addf %243, %242 : vector<8x128xf32>
    %245 = arith.divf %243, %244 : vector<8x128xf32>
    %246 = vector.extract_strided_slice %232 {offsets = [0, 128], sizes = [8, 128], strides = [1, 1]} : vector<8x384xf32> to vector<8x128xf32>
    %247 = vector.extract_strided_slice %237 {offsets = [0, 128], sizes = [8, 128], strides = [1, 1]} : vector<8x384xf32> to vector<8x128xf32>
    %248 = arith.addf %246, %247 : vector<8x128xf32>
    %249 = arith.negf %248 : vector<8x128xf32>
    %250 = math.exp %249 : vector<8x128xf32>
    %cst_81 = arith.constant 1.000000e+00 : f32
    %251 = vector.broadcast %cst_81 : f32 to vector<8x128xf32>
    %252 = arith.addf %251, %250 : vector<8x128xf32>
    %253 = arith.divf %251, %252 : vector<8x128xf32>
    %254 = vector.extract_strided_slice %232 {offsets = [0, 256], sizes = [8, 128], strides = [1, 1]} : vector<8x384xf32> to vector<8x128xf32>
    %255 = vector.extract_strided_slice %237 {offsets = [0, 256], sizes = [8, 128], strides = [1, 1]} : vector<8x384xf32> to vector<8x128xf32>
    %256 = arith.mulf %245, %255 : vector<8x128xf32>
    %257 = arith.addf %254, %256 : vector<8x128xf32>
    %258 = math.tanh %257 : vector<8x128xf32>
    %cst_82 = arith.constant 1.000000e+00 : f32
    %259 = vector.broadcast %cst_82 : f32 to vector<8x128xf32>
    %260 = arith.subf %259, %253 : vector<8x128xf32>
    %261 = arith.mulf %260, %258 : vector<8x128xf32>
    %262 = arith.mulf %253, %195 : vector<8x128xf32>
    %263 = arith.addf %261, %262 : vector<8x128xf32>
    %c1_83 = arith.constant 1 : index
    %c0_84 = arith.constant 0 : index
    %c0_85 = arith.constant 0 : index
    %264 = vector.load %arg3[%c1_83, %c0_84, %c0_85] : memref<2x128x384xbf16, #tpu.memory_space<vmem>>, vector<1x128x384xbf16>
    %265 = vector.shape_cast %264 : vector<1x128x384xbf16> to vector<128x384xbf16>
    %266 = arith.truncf %263 : vector<8x128xf32> to vector<8x128xbf16>
    %cst_86 = arith.constant dense<0.000000e+00> : vector<8x384xf32>
    %267 = tpu.matmul %266, %265, %cst_86 {dimension_numbers = #tpu.dot_dimension_numbers<[1], [0], [0], [1], [0, 0, 1, 1], [], []>} : vector<8x128xbf16>, vector<128x384xbf16>, vector<8x384xf32> -> vector<8x384xf32>
    %268 = arith.addf %267, %10 : vector<8x384xf32>
    %c1_87 = arith.constant 1 : index
    %c0_88 = arith.constant 0 : index
    %c0_89 = arith.constant 0 : index
    %269 = vector.load %arg4[%c1_87, %c0_88, %c0_89] : memref<2x128x384xbf16, #tpu.memory_space<vmem>>, vector<1x128x384xbf16>
    %270 = vector.shape_cast %269 : vector<1x128x384xbf16> to vector<128x384xbf16>
    %271 = arith.truncf %231 : vector<8x128xf32> to vector<8x128xbf16>
    %cst_90 = arith.constant dense<0.000000e+00> : vector<8x384xf32>
    %272 = tpu.matmul %271, %270, %cst_90 {dimension_numbers = #tpu.dot_dimension_numbers<[1], [0], [0], [1], [0, 0, 1, 1], [], []>} : vector<8x128xbf16>, vector<128x384xbf16>, vector<8x384xf32> -> vector<8x384xf32>
    %273 = arith.addf %272, %18 : vector<8x384xf32>
    %274 = vector.extract_strided_slice %268 {offsets = [0, 0], sizes = [8, 128], strides = [1, 1]} : vector<8x384xf32> to vector<8x128xf32>
    %275 = vector.extract_strided_slice %273 {offsets = [0, 0], sizes = [8, 128], strides = [1, 1]} : vector<8x384xf32> to vector<8x128xf32>
    %276 = arith.addf %274, %275 : vector<8x128xf32>
    %277 = arith.negf %276 : vector<8x128xf32>
    %278 = math.exp %277 : vector<8x128xf32>
    %cst_91 = arith.constant 1.000000e+00 : f32
    %279 = vector.broadcast %cst_91 : f32 to vector<8x128xf32>
    %280 = arith.addf %279, %278 : vector<8x128xf32>
    %281 = arith.divf %279, %280 : vector<8x128xf32>
    %282 = vector.extract_strided_slice %268 {offsets = [0, 128], sizes = [8, 128], strides = [1, 1]} : vector<8x384xf32> to vector<8x128xf32>
    %283 = vector.extract_strided_slice %273 {offsets = [0, 128], sizes = [8, 128], strides = [1, 1]} : vector<8x384xf32> to vector<8x128xf32>
    %284 = arith.addf %282, %283 : vector<8x128xf32>
    %285 = arith.negf %284 : vector<8x128xf32>
    %286 = math.exp %285 : vector<8x128xf32>
    %cst_92 = arith.constant 1.000000e+00 : f32
    %287 = vector.broadcast %cst_92 : f32 to vector<8x128xf32>
    %288 = arith.addf %287, %286 : vector<8x128xf32>
    %289 = arith.divf %287, %288 : vector<8x128xf32>
    %290 = vector.extract_strided_slice %268 {offsets = [0, 256], sizes = [8, 128], strides = [1, 1]} : vector<8x384xf32> to vector<8x128xf32>
    %291 = vector.extract_strided_slice %273 {offsets = [0, 256], sizes = [8, 128], strides = [1, 1]} : vector<8x384xf32> to vector<8x128xf32>
    %292 = arith.mulf %281, %291 : vector<8x128xf32>
    %293 = arith.addf %290, %292 : vector<8x128xf32>
    %294 = math.tanh %293 : vector<8x128xf32>
    %cst_93 = arith.constant 1.000000e+00 : f32
    %295 = vector.broadcast %cst_93 : f32 to vector<8x128xf32>
    %296 = arith.subf %295, %289 : vector<8x128xf32>
    %297 = arith.mulf %296, %294 : vector<8x128xf32>
    %298 = arith.mulf %289, %231 : vector<8x128xf32>
    %299 = arith.addf %297, %298 : vector<8x128xf32>
    %300 = tpu.concatenate %95, %163, %231, %299 in 0 : vector<8x128xf32>, vector<8x128xf32>, vector<8x128xf32>, vector<8x128xf32> -> vector<32x128xf32>
    %c0_94 = arith.constant 0 : index
    %c0_95 = arith.constant 0 : index
    %301 = vector.load %arg7[%c0_94, %c0_95] : memref<128x64xbf16, #tpu.memory_space<vmem>>, vector<128x64xbf16>
    %302 = arith.truncf %300 : vector<32x128xf32> to vector<32x128xbf16>
    %cst_96 = arith.constant dense<0.000000e+00> : vector<32x64xf32>
    %303 = tpu.matmul %302, %301, %cst_96 {dimension_numbers = #tpu.dot_dimension_numbers<[1], [0], [0], [1], [0, 0, 1, 1], [], []>} : vector<32x128xbf16>, vector<128x64xbf16>, vector<32x64xf32> -> vector<32x64xf32>
    %c0_97 = arith.constant 0 : index
    %c0_98 = arith.constant 0 : index
    %304 = vector.load %arg8[%c0_97, %c0_98] : memref<1x64xf32, #tpu.memory_space<vmem>>, vector<1x64xf32>
    %305 = vector.broadcast %304 : vector<1x64xf32> to vector<32x64xf32>
    %306 = arith.addf %303, %305 : vector<32x64xf32>
    %cst_99 = arith.constant 0.000000e+00 : f32
    %307 = vector.broadcast %cst_99 : f32 to vector<32x64xf32>
    %308 = arith.maximumf %306, %307 : vector<32x64xf32>
    %c0_100 = arith.constant 0 : index
    %c0_101 = arith.constant 0 : index
    %309 = vector.load %arg9[%c0_100, %c0_101] : memref<64x16xbf16, #tpu.memory_space<vmem>>, vector<64x16xbf16>
    %310 = arith.truncf %308 : vector<32x64xf32> to vector<32x64xbf16>
    %cst_102 = arith.constant dense<0.000000e+00> : vector<32x16xf32>
    %311 = tpu.matmul %310, %309, %cst_102 {dimension_numbers = #tpu.dot_dimension_numbers<[1], [0], [0], [1], [0, 0, 1, 1], [], []>} : vector<32x64xbf16>, vector<64x16xbf16>, vector<32x16xf32> -> vector<32x16xf32>
    %c0_103 = arith.constant 0 : index
    %c0_104 = arith.constant 0 : index
    %312 = vector.load %arg10[%c0_103, %c0_104] : memref<1x16xf32, #tpu.memory_space<vmem>>, vector<1x16xf32>
    %313 = vector.broadcast %312 : vector<1x16xf32> to vector<32x16xf32>
    %314 = arith.addf %311, %313 : vector<32x16xf32>
    %315 = tpu.iota {dimensions = array<i32: 1>} : vector<32x16xi32>
    %cst_105 = arith.constant dense<0xFF800000> : vector<32xf32>
    %316 = vector.multi_reduction <maximumf>, %314, %cst_105 [1] : vector<32x16xf32> to vector<32xf32>
    %317 = vector.shape_cast %316 : vector<32xf32> to vector<32x1xf32>
    %318 = vector.broadcast %317 : vector<32x1xf32> to vector<32x16xf32>
    %319 = arith.cmpf oeq, %314, %318 : vector<32x16xf32>
    %c16_i32 = arith.constant 16 : i32
    %320 = vector.broadcast %c16_i32 : i32 to vector<32x16xi32>
    %321 = arith.select %319, %315, %320 : vector<32x16xi1>, vector<32x16xi32>
    %cst_106 = arith.constant dense<2147483647> : vector<32xi32>
    %322 = vector.multi_reduction <minsi>, %321, %cst_106 [1] : vector<32x16xi32> to vector<32xi32>
    %323 = vector.shape_cast %322 : vector<32xi32> to vector<32x1xi32>
    %c0_107 = arith.constant 0 : index
    %c0_108 = arith.constant 0 : index
    %324 = vector.load %arg14[%c0_107, %c0_108] : memref<32x1xi32, #tpu.memory_space<vmem>>, vector<32x1xi32>
    tpu.vector_store %arg14[%c0_107, %c0_108], %323 {strides = array<i32>} : memref<32x1xi32, #tpu.memory_space<vmem>>, vector<32x1xi32>,
    %c0_109 = arith.constant 0 : index
    %c0_110 = arith.constant 0 : index
    %325 = vector.load %arg12[%c0_109, %c0_110] : memref<32x1xi32, #tpu.memory_space<vmem>>, vector<32x1xi32>
    %326 = vector.broadcast %325 : vector<32x1xi32> to vector<32x16xi32>
    %327 = arith.cmpi eq, %315, %326 : vector<32x16xi32>
    %328 = vector.broadcast %317 : vector<32x1xf32> to vector<32x16xf32>
    %329 = arith.subf %314, %328 : vector<32x16xf32>
    %330 = math.exp %329 : vector<32x16xf32>
    %cst_111 = arith.constant dense<0.000000e+00> : vector<32xf32>
    %331 = vector.multi_reduction <add>, %330, %cst_111 [1] : vector<32x16xf32> to vector<32xf32>
    %332 = vector.shape_cast %331 : vector<32xf32> to vector<32x1xf32>
    %333 = math.log %332 : vector<32x1xf32>
    %334 = arith.addf %317, %333 : vector<32x1xf32>
    %cst_112 = arith.constant 0.000000e+00 : f32
    %335 = vector.broadcast %cst_112 : f32 to vector<32x16xf32>
    %336 = arith.select %327, %314, %335 : vector<32x16xi1>, vector<32x16xf32>
    %cst_113 = arith.constant dense<0.000000e+00> : vector<32xf32>
    %337 = vector.multi_reduction <add>, %336, %cst_113 [1] : vector<32x16xf32> to vector<32xf32>
    %338 = vector.shape_cast %337 : vector<32xf32> to vector<32x1xf32>
    %339 = arith.subf %334, %338 : vector<32x1xf32>
    %c0_114 = arith.constant 0 : index
    %c0_115 = arith.constant 0 : index
    %340 = vector.load %arg13[%c0_114, %c0_115] : memref<32x1xf32, #tpu.memory_space<vmem>>, vector<32x1xf32>
    %341 = arith.mulf %339, %340 : vector<32x1xf32>
    %cst_116 = arith.constant 0.000000e+00 : f32
    %342 = vector.broadcast %cst_116 : f32 to vector<1x1xf32>
    %343 = vector.shape_cast %341 : vector<32x1xf32> to vector<1x32x1xf32>
    %cst_117 = arith.constant dense<0.000000e+00> : vector<1xf32>
    %344 = vector.multi_reduction <add>, %343, %cst_117 [1, 2] : vector<1x32x1xf32> to vector<1xf32>
    %345 = vector.shape_cast %344 : vector<1xf32> to vector<1x1x1xf32>
    %346 = vector.extract %345[0, 0, 0] : f32 from vector<1x1x1xf32>
    %cst_118 = arith.constant 8.000000e+00 : f32
    %347 = arith.divf %346, %cst_118 : f32
    %348 = vector.broadcast %347 : f32 to vector<1x1xf32>
    %349 = arith.addf %342, %348 : vector<1x1xf32>
    %c0_119 = arith.constant 0 : index
    %c0_120 = arith.constant 0 : index
    %350 = vector.load %arg15[%c0_119, %c0_120] : memref<1x1xf32, #tpu.memory_space<vmem>>, vector<1x1xf32>
    tpu.vector_store %arg15[%c0_119, %c0_120], %349 {strides = array<i32>} : memref<1x1xf32, #tpu.memory_space<vmem>>, vector<1x1xf32>,
    return
  }
}

</mosaic_0001>

<bundles_post_ra>
// kernel: tpu_custom_call.1
= control target key start
LH: loop header
LB: loop body
LE: loop exit
PB: predicated region body
PF: predicated region fallthrough
CT: control target
= control target key end

     0   :  { %21 = vsyncpa [#allocation3], 0  ;;  %s4515_s0 = inlined_call_operand.vmem [shape: f32[8,16], index: 0, kind: input, shape index: {}]   ;;  %s4516_s1 = inlined_call_operand.vmem [shape: bf16[16,128], index: 1, kind: input, shape index: {}]   ;;  %s4517_s2 = inlined_call_operand.vmem [shape: f32[1,128], index: 2, kind: input, shape index: {}]   ;;  %s4518_s3 = inlined_call_operand.hbm [shape: bf16[2,128,384], index: 3, kind: input, shape index: {}]   ;;  %s4519_s4 = inlined_call_operand.hbm [shape: bf16[2,128,384], index: 4, kind: input, shape index: {}]   ;;  %s4520_s5 = inlined_call_operand.vmem [shape: f32[2,1,384], index: 5, kind: input, shape index: {}]   ;;  %s4521_s6 = inlined_call_operand.vmem [shape: f32[2,1,384], index: 6, kind: input, shape index: {}]   ;;  %s4522_s7 = inlined_call_operand.vmem [shape: bf16[128,64], index: 7, kind: input, shape index: {}]   ;;  %s4523_s8 = inlined_call_operand.vmem [shape: f32[1,64], index: 8, kind: input, shape index: {}]   ;;  %s4524_s9 = inlined_call_operand.vmem [shape: bf16[64,16], index: 9, kind: input, shape index: {}]   ;;  %s4525_s10 = inlined_call_operand.vmem [shape: f32[1,16], index: 10, kind: input, shape index: {}]   ;;  %s4526_s11 = inlined_call_operand.vmem [shape: f32[32,128], index: 11, kind: input, shape index: {}]   ;;  %s4527_s12 = inlined_call_operand.vmem [shape: s32[32,1], index: 12, kind: input, shape index: {}]   ;;  %s4528_s13 = inlined_call_operand.vmem [shape: f32[32,1], index: 13, kind: input, shape index: {}]   ;;  %s4529_s14 = inlined_call_operand.vmem [shape: s32[32,1], index: 14, kind: output, shape index: {0}]   ;;  %s4530_s15 = inlined_call_operand.hbm [shape: f32[1,1], index: 15, kind: output, shape index: {1}]  }
   0x1   :  { %22 = vsyncpa [#allocation6], 0 }
   0x2   :  { %23 = vsyncpa [#allocation4], 0  ;;  %s3499_s18 = smov [#allocation2]  }
   0x3   :  { %s35_s19 = sshll.u32 %s3499_s18, 4  ;;  %s36_s19 = int_to_ptr.vmem [resolvable:$true] %s35_s19 }
   0x4   :  { %s3441_s20 = scalar_lea.vmem %s36_s19, 6144  ;;  %p3446_p1 = scmp.lt.s32.totalorder %s36_s19, %s36_s19 }
   0x5   :  { %p3442_p0 = scmp.ne.s32.totalorder %s36_s19, %s3441_s20  ;;  %p3447_p2 = scmp.lt.s32.totalorder %s3441_s20, %s3441_s20 }
   0x7   :  { %p3448_p3 = por %p3447_p2, %p3446_p1 }
   0x9   :  { %p3449_p4 = pnand %p3448_p3, %p3442_p0 }
   0xb   :  { %3452 = shalt.err (!%p3449_p4)
}
   0xc   :  { %s3500_s21 = smov 192   ;;  %s3501_s22 = smov 12  }
   0xd   :  { %41 = dma.hbm_to_vmem [thread:$0]  %s4518_s3, 6144, %s36_s19, [#allocation3], %s3500_s21, %s3500_s21, %s3501_s22  }
   0xe   :  { %s3502_s25 = smov [#allocation5]  }
   0xf   :  { %s47_s26 = sshll.u32 %s3502_s25, 4  ;;  %s48_s26 = int_to_ptr.vmem [resolvable:$true] %s47_s26 }
  0x10   :  { %s3461_s27 = scalar_lea.vmem %s48_s26, 6144  ;;  %p3466_p6 = scmp.lt.s32.totalorder %s48_s26, %s48_s26 }
  0x11   :  { %p3462_p5 = scmp.ne.s32.totalorder %s48_s26, %s3461_s27  ;;  %p3467_p7 = scmp.lt.s32.totalorder %s3461_s27, %s3461_s27 }
  0x13   :  { %p3468_p8 = por %p3467_p7, %p3466_p6 }
  0x15   :  { %p3469_p9 = pnand %p3468_p8, %p3462_p5 }
  0x17   :  { %3472 = shalt.err (!%p3469_p9)
}
  0x18   :  { %53 = dma.hbm_to_vmem [thread:$0]  %s4519_s4, 6144, %s48_s26, [#allocation6], %s3500_s21, %s3500_s21, %s3501_s22  }
  0x19   :  { %3493 = dma.done.wait [#allocation3], 6144  }
  0x1a   :  { %3494 = vsyncadd [#allocation3], 4294961152 }
  0x1b   :  { %3495 = dma.done.wait [#allocation6], 6144  }
  0x1c   :  { %3496 = vsyncadd [#allocation6], 4294961152  ;;  %v4544_v0 = vmov 0.0   ;;  %vm3504_vm0 = vmmov 0   ;;  %v4532_v1 = vmov 0   ;;  %v3124_v2 = vld [vmem:[%s4516_s1] sm:$0xff]  }
  0x1d   :  { %2814 = vmatprep.subr.bf16.mxu0 %v4544_v0  ;;  %2816 = vmatprep.mubr.msk.bf16.mxu0 %vm3504_vm0, %v4544_v0  ;;  %v79_v3 = vld [vmem:[%s4515_s0] sm:$0xff]  ;;  %vm96_vm1 = vcmask 130048   ;;  %v3125_v5 = vld [vmem:[#allocation2 + $0xac] ss:$12 sps:$4 sm:$0xff]   ;;  %v3127_v6 = vld [vmem:[#allocation2 + $0xa8] ss:$12 sps:$4 sm:$0xff]  }
  0x1e   :  { %408 = vmatprep.mubr.bf16.mxu1 %v4532_v1  ;;  %3123 = vset.pattern.permute.xlu1 %v4532_v1  ;;  %v82_v4 = vpack.c.bf16 %v79_v3, %v79_v3  ;;  %v3128_v7 = vld [vmem:[#allocation2 + $0x94] ss:$12 sps:$4 sm:$0xff]   ;;  %v3131_v8 = vld [vmem:[#allocation2 + $0xb0] ss:$12 sps:$4 sm:$0xff]   ;;  %v3135_v11 = vld [vmem:[#allocation2 + $0x98] ss:$12 sps:$4 sm:$0xff]  }
  0x1f   :  { %3122 = vset.pattern.permute.xlu0 %v4532_v1  ;;  %2815 = vmatpush3.bf16.msra.mxu0 %v3124_v2  ;;  %v3130_v9 = vld [vmem:[#allocation2 + $0x90] ss:$12 sps:$4 sm:$0xff]   ;;  %v3134_v12 = vld [vmem:[#allocation2 + $0x78] ss:$12 sps:$4 sm:$0xff]   ;;  %v3139_v13 = vld [vmem:[#allocation2 + $0x80] ss:$12 sps:$4 sm:$0xff]  }
  0x20   :  { %376 = vmatprep.subr.bf16.mxu1 %v3125_v5  ;;  %2820 = vmatprep.subr.bf16.mxu0 %v3131_v8  ;;  %v3132_v10 = vld [vmem:[#allocation2 + $0x7c] ss:$12 sps:$4 sm:$0xff]   ;;  %v3136_v14 = vld [vmem:[#allocation2 + $0x64] ss:$12 sps:$4 sm:$0xff]   ;;  %v3138_v16 = vld [vmem:[#allocation2 + $0x60] ss:$12 sps:$4 sm:$0xff]  }
  0x21   :  { %377 = vmatpush1.bf16.msra.mxu1 %v3127_v6  ;;  %v3143_v15 = vld [vmem:[#allocation2 + $0x68] ss:$12 sps:$4 sm:$0xff]   ;;  %v3140_v17 = vld [vmem:[#allocation2 + $0x4c] ss:$12 sps:$4 sm:$0xff]   ;;  %v3147_v18 = vld [vmem:[#allocation2 + $0x50] ss:$12 sps:$4 sm:$0xff]  }
  0x22   :  { %2817 = vmatmul.mubr.msk.bf16.vlgmr.msra.gmra.mxu0 %vm96_vm1, %v82_v4  ;;  %378 = vmatprep.subr.bf16.mxu1 %v3128_v7  ;;  %v3142_v19 = vld [vmem:[#allocation2 + $0x48] ss:$12 sps:$4 sm:$0xff]   ;;  %v193_v21 = vld [vmem:[%s4526_s11] sm:$0xff]  ;;  %v3146_v25 = vld [vmem:[#allocation2 + $0x30] ss:$12 sps:$4 sm:$0xff]   ;;  %v4531_v4 = vlaneseq  ;;  %vm2275_vm2 = vcmask 523264  }
  0x23   :  { %2821 = vmatpush3.bf16.msra.mxu0 %v3131_v8  ;;  %v3144_v20 = vld [vmem:[#allocation2 + $0x34] ss:$12 sps:$4 sm:$0xff]   ;;  %v194_v22 = vld [vmem:[%s4526_s11 + $0x8] sm:$0xff]  ;;  %v3151_v23 = vld [vmem:[#allocation2 + $0x38] ss:$12 sps:$4 sm:$0xff]   ;;  %vm2413_vm13 = vcmask 7168  }
  0x24   :  { %2822 = vmatprep.subr.bf16.mxu0 %v3135_v11  ;;  %v229_v24 = vpack.c.bf16 %v194_v22, %v193_v21  ;;  %v3148_v26 = vld [vmem:[#allocation2 + $0x1c] ss:$12 sps:$4 sm:$0xff]   ;;  %v3155_v27 = vld [vmem:[#allocation2 + $0x20] ss:$12 sps:$4 sm:$0xff]   ;;  %v3150_v28 = vld [vmem:[#allocation2 + $0x18] ss:$12 sps:$4 sm:$0xff]  }
  0x25   :  { %379 = vmatpush1.bf16.msra.mxu1 %v3130_v9  ;;  %v3152_v29 = vld [vmem:[#allocation2 + $0x4] ss:$12 sps:$4 sm:$0xff]   ;;  %v3156_v30 = vld [vmem:[#allocation2 + $0x8] ss:$12 sps:$4 sm:$0xff]   ;;  %v3154_v31 = vld [vmem:[#allocation2] ss:$12 sps:$4 sm:$0xff]  }
  0x26   :  { %380 = vmatprep.subr.bf16.mxu1 %v3132_v10  ;;  %2836 = vmatprep.mubr.bf16.mxu0 %v229_v24  ;;  %v3612_v32 = vld [vmem:[#allocation5 + $0xac] ss:$12 sps:$4 sm:$0xff]   ;;  %v195_v33 = vld [vmem:[%s4526_s11 + $0x10] sm:$0xff]  ;;  %v3633_v41 = vld [vmem:[#allocation5 + $0x7c] ss:$12 sps:$4 sm:$0xff]   ;;  %v144_v5 = vshrl.u32 %v4531_v4, 7 }
  0x27   :  { %2823 = vmatpush3.bf16.msra.mxu0 %v3135_v11  ;;  %v196_v34 = vld [vmem:[%s4526_s11 + $0x18] sm:$0xff]  ;;  %v3620_v35 = vld [vmem:[#allocation5 + $0xa8] ss:$12 sps:$4 sm:$0xff]   ;;  %v3643_v43 = vld [vmem:[#allocation5 + $0x64] ss:$12 sps:$4 sm:$0xff]   ;;  %s3506_s3 = smov [#allocation7]  }
  0x28   :  { %2824 = vmatprep.subr.bf16.mxu0 %v3139_v13  ;;  %v230_v36 = vpack.c.bf16 %v196_v34, %v195_v33  ;;  %v3623_v37 = vld [vmem:[#allocation5 + $0x94] ss:$12 sps:$4 sm:$0xff]   ;;  %v3625_v38 = vld [vmem:[#allocation5 + $0xb0] ss:$12 sps:$4 sm:$0xff]   ;;  %v3631_v40 = vld [vmem:[#allocation5 + $0x98] ss:$12 sps:$4 sm:$0xff]  }
  0x29   :  { %381 = vmatpush1.bf16.msra.mxu1 %v3134_v12  ;;  %v3628_v39 = vld [vmem:[#allocation5 + $0x90] ss:$12 sps:$4 sm:$0xff]   ;;  %v3638_v42 = vld [vmem:[#allocation5 + $0x78] ss:$12 sps:$4 sm:$0xff]   ;;  %v3646_v44 = vld [vmem:[#allocation5 + $0x80] ss:$12 sps:$4 sm:$0xff]  }
  0x2a   :  { %382 = vmatprep.subr.bf16.mxu1 %v3136_v14  ;;  %v3650_v45 = vld [vmem:[#allocation5 + $0x60] ss:$12 sps:$4 sm:$0xff]   ;;  %v3656_v47 = vld [vmem:[#allocation5 + $0x68] ss:$12 sps:$4 sm:$0xff]   ;;  %v3667_v50 = vld [vmem:[#allocation5 + $0x50] ss:$12 sps:$4 sm:$0xff]  }
  0x2b   :  { %2825 = vmatpush3.bf16.msra.mxu0 %v3139_v13  ;;  %v3653_v46 = vld [vmem:[#allocation5 + $0x4c] ss:$12 sps:$4 sm:$0xff]   ;;  %v3661_v48 = vld [vmem:[#allocation5 + $0x48] ss:$12 sps:$4 sm:$0xff]   ;;  %v3671_v51 = vld [vmem:[#allocation5 + $0x30] ss:$12 sps:$4 sm:$0xff]  }
  0x2c   :  { %2826 = vmatprep.subr.bf16.mxu0 %v3143_v15  ;;  %v3664_v49 = vld [vmem:[#allocation5 + $0x34] ss:$12 sps:$4 sm:$0xff]   ;;  %v3674_v52 = vld [vmem:[#allocation5 + $0x1c] ss:$12 sps:$4 sm:$0xff]   ;;  %v3677_v53 = vld [vmem:[#allocation5 + $0x38] ss:$12 sps:$4 sm:$0xff]  }
  0x2d   :  { %383 = vmatpush1.bf16.msra.mxu1 %v3138_v16  ;;  %v3681_v54 = vld [vmem:[#allocation5 + $0x18] ss:$12 sps:$4 sm:$0xff]   ;;  %v3685_v55 = vld [vmem:[#allocation5 + $0x20] ss:$12 sps:$4 sm:$0xff]   ;;  %v3697_v58 = vld [vmem:[#allocation5 + $0x8] ss:$12 sps:$4 sm:$0xff]  }
  0x2e   :  { %384 = vmatprep.subr.bf16.mxu1 %v3140_v17  ;;  %v3693_v56 = vld [vmem:[#allocation5 + $0x4] ss:$12 sps:$4 sm:$0xff]   ;;  %v3695_v57 = vld [vmem:[#allocation5] ss:$12 sps:$4 sm:$0xff]   ;;  %v3718_v6 = vsub.s32 0, %v144_v5  ;;  %v3720_v7 = vsub.s32 2, %v144_v5 }
  0x2f   :  { %2827 = vmatpush3.bf16.msra.mxu0 %v3143_v15  ;;  %v2545_v59 = vld [vmem:[%s4517_s2] ss:$0 sm:$0xff]  ;;  %v3725_v9 = vsub.s32 1, %v144_v5  ;;  %v3767_v33 = vld [vmem:[#allocation2 + $0x170] ss:$12 sps:$4 sm:$0xff]  }
  0x30   :  { %2828 = vmatprep.subr.bf16.mxu0 %v3147_v18  ;;  %4602 = vst [vmem:[#allocation11_spill] sm:$0xff] %v3718_v6  ;;  %v231_v8 = vld [vmem:[%s4520_s5] sm:$0x7]  ;;  %4612 = vst [vmem:[#allocation21_spill] sm:$0xff] %v3767_v33  ;;  %v3824_v4 = vld [vmem:[#allocation2 + $0xd8] ss:$12 sps:$4 sm:$0xff]  }
  0x31   :  { %385 = vmatpush1.bf16.msra.mxu1 %v3142_v19  ;;  %4603 = vst [vmem:[#allocation12_spill] sm:$0xff] %v3725_v9  ;;  %v3728_v10 = vrot.slane %v231_v8, %v3720_v7  ;;  %v3733_v12 = vrot.slane %v231_v8, %v3718_v6  ;;  %v3738_v15 = vrot.slane %v231_v8, %v3725_v9  ;;  %v3772_v34 = vld [vmem:[#allocation2 + $0x154] ss:$12 sps:$4 sm:$0xff]   ;;  %4629 = vst [vmem:[#allocation38_spill] sm:$0xff] %v3824_v4 }
  0x32   :  { %386 = vmatprep.subr.bf16.mxu1 %v3144_v20  ;;  %4613 = vst [vmem:[#allocation22_spill] sm:$0xff] %v3772_v34  ;;  %v3795_v5 = vld [vmem:[#allocation2 + $0x120] ss:$12 sps:$4 sm:$0xff]   ;;  %v3797_v8 = vld [vmem:[#allocation2 + $0x128] ss:$12 sps:$4 sm:$0xff]  }
  0x33   :  { %2829 = vmatpush3.bf16.msra.mxu0 %v3147_v18  ;;  %4604 = vst [vmem:[#allocation13_spill] sm:$0xff] %v3738_v15  ;;  %4620 = vst [vmem:[#allocation29_spill] sm:$0xff] %v3795_v5 }
  0x34   :  { %2830 = vmatprep.subr.bf16.mxu0 %v3151_v23  ;;  %4621 = vst [vmem:[#allocation30_spill] sm:$0xff] %v3797_v8 }
  0x35   :  { %387 = vmatpush1.bf16.msra.mxu1 %v3146_v25 }
  0x36   :  { %388 = vmatprep.subr.bf16.mxu1 %v3148_v26 }
  0x37   :  { %2831 = vmatpush3.bf16.msra.mxu0 %v3151_v23 }
  0x38   :  { %2832 = vmatprep.subr.bf16.mxu0 %v3155_v27 }
  0x39   :  { %389 = vmatpush1.bf16.msra.mxu1 %v3150_v28 }
  0x3a   :  { %390 = vmatprep.subr.bf16.mxu1 %v3152_v29 }
  0x3b   :  { %2833 = vmatpush3.bf16.msra.mxu0 %v3155_v27 }
  0x3c   :  { %2834 = vmatprep.subr.bf16.mxu0 %v3156_v30 }
  0x3d   :  { %391 = vmatpush1.bf16.msra.mxu1 %v3154_v31  ;;  %v3765_v31 = vld [vmem:[#allocation2 + $0x168] ss:$12 sps:$4 sm:$0xff]  }
  0x3e   :  { %639 = vmatprep.subr.bf16.mxu1 %v3612_v32 }
  0x3f   :  { %2835 = vmatpush3.bf16.msra.mxu0 %v3156_v30  ;;  %v3763_v30 = vld [vmem:[#allocation2 + $0x16c] ss:$12 sps:$4 sm:$0xff]  }
  0x40   :  { %409 = vmatmul.mubr.bf16.vlgmr.msra.gmra.mxu1 %v229_v24  ;;  %2840 = vmatprep.subr.bf16.mxu0 %v4544_v0 }
  0x41   :  { %640 = vmatpush1.bf16.msra.mxu1 %v3620_v35  ;;  %418 = vmatprep.mubr.bf16.mxu1 %v4532_v1 }
  0x42   :  { %2837 = vmatmul.mubr.bf16.vlgmr.msra.gmra.mxu0 %v230_v36  ;;  %641 = vmatprep.subr.bf16.mxu1 %v3623_v37 }
  0x43   :  { %2841 = vmatpush3.bf16.msra.mxu0 %v3625_v38  ;;  %2856 = vmatprep.mubr.msk.bf16.mxu0 %vm3504_vm0, %v4544_v0 }
  0x44   :  { %2842 = vmatprep.subr.bf16.mxu0 %v4544_v0 }
  0x45   :  { %642 = vmatpush1.bf16.msra.mxu1 %v3628_v39 }
  0x46   :  { %643 = vmatprep.subr.bf16.mxu1 %v3633_v41 }
  0x47   :  { %2843 = vmatpush3.bf16.msra.mxu0 %v3631_v40 }
  0x48   :  { %2844 = vmatprep.subr.bf16.mxu0 %v4544_v0  ;;  %419 = vmatmul.mubr.bf16.gmra.mxu1 %v230_v36  ;;  %v3775_v36 = vld [vmem:[#allocation2 + $0x150] ss:$12 sps:$4 sm:$0xff]  }
  0x49   :  { %644 = vmatpush1.bf16.msra.mxu1 %v3638_v42  ;;  %671 = vmatprep.mubr.bf16.mxu1 %v4532_v1  ;;  %4614 = vst [vmem:[#allocation23_spill] sm:$0xff] %v3775_v36 }
  0x4a   :  { %645 = vmatprep.subr.bf16.mxu1 %v3643_v43 }
  0x4b   :  { %2845 = vmatpush3.bf16.msra.mxu0 %v3646_v44 }
  0x4c   :  { %2846 = vmatprep.subr.bf16.mxu0 %v4544_v0 }
  0x4d   :  { %646 = vmatpush1.bf16.msra.mxu1 %v3650_v45 }
  0x4e   :  { %647 = vmatprep.subr.bf16.mxu1 %v3653_v46 }
  0x4f   :  { %2847 = vmatpush3.bf16.msra.mxu0 %v3656_v47 }
  0x50   :  { %2848 = vmatprep.subr.bf16.mxu0 %v4544_v0 }
  0x51   :  { %648 = vmatpush1.bf16.msra.mxu1 %v3661_v48 }
  0x52   :  { %649 = vmatprep.subr.bf16.mxu1 %v3664_v49 }
  0x53   :  { %2849 = vmatpush3.bf16.msra.mxu0 %v3667_v50 }
  0x54   :  { %2850 = vmatprep.subr.bf16.mxu0 %v4544_v0 }
  0x55   :  { %650 = vmatpush1.bf16.msra.mxu1 %v3671_v51 }
  0x56   :  { %651 = vmatprep.subr.bf16.mxu1 %v3674_v52 }
  0x57   :  { %2851 = vmatpush3.bf16.msra.mxu0 %v3677_v53 }
  0x58   :  { %2852 = vmatprep.subr.bf16.mxu0 %v4544_v0 }
  0x59   :  { %652 = vmatpush1.bf16.msra.mxu1 %v3681_v54 }
  0x5a   :  { %653 = vmatprep.subr.bf16.mxu1 %v3693_v56 }
  0x5b   :  { %2853 = vmatpush3.bf16.msra.mxu0 %v3685_v55 }
  0x5c   :  { %2854 = vmatprep.subr.bf16.mxu0 %v4544_v0 }
  0x5d   :  { %654 = vmatpush1.bf16.msra.mxu1 %v3695_v57 }
  0x5e   :  { %903 = vmatprep.subr.bf16.mxu1 %v3763_v30 }
  0x5f   :  { %2855 = vmatpush3.bf16.msra.mxu0 %v3697_v58 }
  0x60   :  { %2860 = vmatprep.subr.bf16.mxu0 %v4544_v0 }
  0xe2   :  { %v134_v60 = vpop.f32.mrf.mxu0 }
  0xe3   :  { %v3706_v61 = vadd.f32 %v2545_v59, %v134_v60  ;;  %v3777_v59 = vld [vmem:[#allocation2 + $0x158] ss:$12 sps:$4 sm:$0xff]   ;;  %v3782_v60 = vld [vmem:[#allocation2 + $0x13c] ss:$12 sps:$4 sm:$0xff]  }
  0xe4   :  { %v2818_v62 = vpop.f32.mrf.mxu0  ;;  %4615 = vst [vmem:[#allocation24_spill] sm:$0xff] %v3777_v59  ;;  %4616 = vst [vmem:[#allocation25_spill] sm:$0xff] %v3782_v60 }
  0xe5   :  { %v3710_v63 = vpack.c.bf16 %v3706_v61, %v3706_v61  ;;  %v3785_v62 = vld [vmem:[#allocation2 + $0x138] ss:$12 sps:$4 sm:$0xff]  }
  0xe6   :  { %v137_v2 = vpop.f32.mrf.mxu0  ;;  %4617 = vst [vmem:[#allocation26_spill] sm:$0xff] %v3785_v62 }
  0xe7   :  { %672 = vmatmul.mubr.bf16.vlgmr.msra.gmra.mxu1 %v3710_v63  ;;  %2857 = vmatmul.mubr.bf16.vlgmr.msra.gmra.mxu0 %v3710_v63  ;;  %v3787_v2 = vld [vmem:[#allocation2 + $0x140] ss:$12 sps:$4 sm:$0xff]  }
  0xe8   :  { %v2819_v3 = vpop.f32.mrf.mxu0  ;;  %935 = vmatprep.mubr.bf16.mxu1 %v4532_v1  ;;  %2876 = vmatprep.mubr.msk.bf16.mxu0 %vm3504_vm0, %v4544_v0  ;;  %4618 = vst [vmem:[#allocation27_spill] sm:$0xff] %v3787_v2  ;;  %v3826_v1 = vld [vmem:[#allocation2 + $0xe0] ss:$12 sps:$4 sm:$0xff]  }
  0xe9   :  { %904 = vmatpush1.bf16.msra.mxu1 %v3765_v31  ;;  %2861 = vmatpush3.bf16.msra.mxu0 %v3767_v33  ;;  %v3792_v3 = vld [vmem:[#allocation2 + $0x124] ss:$12 sps:$4 sm:$0xff]   ;;  %4630 = vst [vmem:[#allocation39_spill] sm:$0xff] %v3826_v1 }
  0xea   :  { %2862 = vmatprep.subr.bf16.mxu0 %v4544_v0  ;;  %905 = vmatprep.subr.bf16.mxu1 %v3772_v34  ;;  %4619 = vst [vmem:[#allocation28_spill] sm:$0xff] %v3792_v3 }
  0xed   :  { %906 = vmatpush1.bf16.msra.mxu1 %v3775_v36  ;;  %2863 = vmatpush3.bf16.msra.mxu0 %v3777_v59 }
  0xee   :  { %2864 = vmatprep.subr.bf16.mxu0 %v4544_v0  ;;  %907 = vmatprep.subr.bf16.mxu1 %v3782_v60 }
  0xf1   :  { %908 = vmatpush1.bf16.msra.mxu1 %v3785_v62  ;;  %2865 = vmatpush3.bf16.msra.mxu0 %v3787_v2 }
  0xf2   :  { %2866 = vmatprep.subr.bf16.mxu0 %v4544_v0  ;;  %909 = vmatprep.subr.bf16.mxu1 %v3792_v3 }
  0xf5   :  { %910 = vmatpush1.bf16.msra.mxu1 %v3795_v5  ;;  %2867 = vmatpush3.bf16.msra.mxu0 %v3797_v8 }
  0xf6   :  { %2868 = vmatprep.subr.bf16.mxu0 %v4544_v0 }
 0x100   :  { %v3730_v11 = vpop.f32.mrf.mxu1 }
 0x102   :  { %v3735_v13 = vpop.f32.mrf.mxu1  ;;  %v2838_v14 = vpop.f32.mrf.mxu0 }
 0x103   :  { %v3741_v16 = vadd.f32 %v2838_v14, %v3728_v10  ;;  %v3802_v14 = vld [vmem:[#allocation2 + $0x10c] ss:$12 sps:$4 sm:$0xff]  }
 0x104   :  { %v414_v17 = vpop.f32.mrf.mxu1  ;;  %v3743_v18 = vpop.f32.mrf.mxu0  ;;  %4622 = vst [vmem:[#allocation31_spill] sm:$0xff] %v3802_v14  ;;  %911 = vmatprep.subr.bf16.mxu1 %v3802_v14 }
 0x105   :  { %4605 = vst [vmem:[#allocation14_spill] sm:$0xff] %v3741_v16  ;;  %v3746_v19 = vadd.f32 %v414_v17, %v3733_v12  ;;  %v3804_v17 = vld [vmem:[#allocation2 + $0x108] ss:$12 sps:$4 sm:$0xff]  }
 0x106   :  { %v416_v20 = vpop.f32.mrf.mxu1  ;;  %v2839_v21 = vpop.f32.mrf.mxu0  ;;  %4623 = vst [vmem:[#allocation32_spill] sm:$0xff] %v3804_v17  ;;  %912 = vmatpush1.bf16.msra.mxu1 %v3804_v17  ;;  %v3836_v16 = vld [vmem:[#allocation2 + $0xc8] ss:$12 sps:$4 sm:$0xff]   ;;  %v413_v17 = vadd.f32 %v3735_v13, %v3738_v15 }
 0x107   :  { %4606 = vst [vmem:[#allocation15_spill] sm:$0xff] %v3746_v19  ;;  %v3749_v22 = vadd.f32 %v416_v20, %v3738_v15  ;;  %v3752_v23 = vadd.f32 %v2839_v21, %v3728_v10  ;;  %v3806_v20 = vld [vmem:[#allocation2 + $0x110] ss:$12 sps:$4 sm:$0xff]   ;;  %v3809_v21 = vld [vmem:[#allocation2 + $0xf4] ss:$12 sps:$4 sm:$0xff]   ;;  %4633 = vst [vmem:[#allocation42_spill] sm:$0xff] %v3836_v16 }
 0x108   :  { %v420_v24 = vpop.f32.mrf.mxu1  ;;  %4624 = vst [vmem:[#allocation33_spill] sm:$0xff] %v3806_v20  ;;  %4625 = vst [vmem:[#allocation34_spill] sm:$0xff] %v3809_v21  ;;  %2869 = vmatpush3.bf16.msra.mxu0 %v3806_v20  ;;  %913 = vmatprep.subr.bf16.mxu1 %v3809_v21 }
 0x109   :  { %4607 = vst [vmem:[#allocation16_spill] sm:$0xff] %v3749_v22  ;;  %4608 = vst [vmem:[#allocation17_spill] sm:$0xff] %v3752_v23  ;;  %v3755_v25 = vadd.f32 %v420_v24, %v3733_v12  ;;  %v3814_v24 = vld [vmem:[#allocation2 + $0xf0] ss:$12 sps:$4 sm:$0xff]   ;;  %2870 = vmatprep.subr.bf16.mxu0 %v4544_v0  ;;  %v3849_v22 = vpop.f32.mrf.mxu0 }
 0x10a   :  { %v422_v26 = vpop.f32.mrf.mxu1  ;;  %4626 = vst [vmem:[#allocation35_spill] sm:$0xff] %v3814_v24  ;;  %914 = vmatpush1.bf16.msra.mxu1 %v3814_v24  ;;  %v3830_v23 = vld [vmem:[#allocation2 + $0xc4] ss:$12 sps:$4 sm:$0xff]   ;;  %4635 = vst [vmem:[#allocation44_spill] sm:$0xff] %v3849_v22 }
 0x10b   :  { %4609 = vst [vmem:[#allocation18_spill] sm:$0xff] %v3755_v25  ;;  %v3758_v27 = vadd.f32 %v422_v26, %v3738_v15  ;;  %v3816_v26 = vld [vmem:[#allocation2 + $0xf8] ss:$12 sps:$4 sm:$0xff]   ;;  %4631 = vst [vmem:[#allocation40_spill] sm:$0xff] %v3830_v23  ;;  %v158_v25 = vld [vmem:[%s4521_s6] sm:$0x7] }
 0x10c   :  { %v424_v28 = vpop.f32.mrf.mxu1  ;;  %4627 = vst [vmem:[#allocation36_spill] sm:$0xff] %v3816_v26  ;;  %2871 = vmatpush3.bf16.msra.mxu0 %v3816_v26  ;;  %v3852_v19 = vrot.slane %v158_v25, %v3718_v6  ;;  %v3933_v15 = vld [vmem:[#allocation5 + $0xf8] ss:$12 sps:$4 sm:$0xff]  }
 0x10d   :  { %4610 = vst [vmem:[#allocation19_spill] sm:$0xff] %v3758_v27  ;;  %v3761_v29 = vadd.f32 %v424_v28, %v3733_v12  ;;  %v3820_v28 = vld [vmem:[#allocation2 + $0xdc] ss:$12 sps:$4 sm:$0xff]   ;;  %2872 = vmatprep.subr.bf16.mxu0 %v4544_v0  ;;  %v3840_v27 = vld [vmem:[#allocation5 + $0x16c] ss:$12 sps:$4 sm:$0xff]  }
 0x10e   :  { %4628 = vst [vmem:[#allocation37_spill] sm:$0xff] %v3820_v28  ;;  %915 = vmatprep.subr.bf16.mxu1 %v3820_v28  ;;  %4634 = vst [vmem:[#allocation43_spill] sm:$0xff] %v3840_v27 }
 0x10f   :  { %4611 = vst [vmem:[#allocation20_spill] sm:$0xff] %v3761_v29  ;;  %916 = vmatpush1.bf16.msra.mxu1 %v3824_v4  ;;  %v3834_v29 = vld [vmem:[#allocation2 + $0xc0] ss:$12 sps:$4 sm:$0xff]   ;;  %4636 = vst [vmem:[#allocation45_spill] sm:$0xff] %v3852_v19 }
 0x110   :  { %2873 = vmatpush3.bf16.msra.mxu0 %v3826_v1  ;;  %4632 = vst [vmem:[#allocation41_spill] sm:$0xff] %v3834_v29  ;;  %917 = vmatprep.subr.bf16.mxu1 %v3830_v23  ;;  %v3854_v23 = vpop.f32.mrf.mxu1 }
 0x111   :  { %2874 = vmatprep.subr.bf16.mxu0 %v4544_v0  ;;  %4637 = vst [vmem:[#allocation46_spill] sm:$0xff] %v3854_v23 }
 0x113   :  { %918 = vmatpush1.bf16.msra.mxu1 %v3834_v29 }
 0x114   :  { %2875 = vmatpush3.bf16.msra.mxu0 %v3836_v16  ;;  %1145 = vmatprep.subr.bf16.mxu1 %v3840_v27  ;;  %v411_v16 = vadd.f32 %v3730_v11, %v3733_v12 }
 0x115   :  { %2880 = vmatprep.subr.bf16.mxu0 %v4544_v0  ;;  %v3860_v0 = vrot.slane %v158_v25, %v3725_v9 }
 0x1a7   :  { %v673_v1 = vpop.f32.mrf.mxu1  ;;  %v714_v4 = vpop.f32.mrf.mxu0 }
 0x1a8   :  { %v674_v27 = vadd.f32 %v673_v1, %v3852_v19 }
 0x1a9   :  { %v675_v29 = vpop.f32.mrf.mxu1  ;;  %v2858_v28 = vpop.f32.mrf.mxu0 }
 0x1aa   :  { %v720_v26 = vadd.f32 %v674_v27, %v411_v16  ;;  %v676_v6 = vadd.f32 %v675_v29, %v3860_v0  ;;  %v3866_v16 = vrot.slane %v158_v25, %v3720_v7  ;;  %v3874_v25 = vld [vmem:[#allocation5 + $0x168] ss:$12 sps:$4 sm:$0xff]   ;;  %v3888_v28 = vld [vmem:[#allocation5 + $0x150] ss:$12 sps:$4 sm:$0xff]  }
 0x1ab   :  { %v677_v24 = vpop.f32.mrf.mxu1  ;;  %v717_v22 = vpop.f32.mrf.mxu0 }
 0x1ac   :  { %v2598_v21 = vmul.f32 -1.442695, %v720_v26  ;;  %v727_v11 = vadd.f32 %v676_v6, %v413_v17  ;;  %v715_v27 = vadd.f32 %v714_v4, %v3866_v16 }
 0x1ad   :  { %v678_v20 = vpop.f32.mrf.mxu1  ;;  %v2859_v23 = vpop.f32.mrf.mxu0 }
 0x1ae   :  { %3265 = vpow2.f32 %v2598_v21  ;;  %v2599_v12 = vmul.f32 -1.442695, %v727_v11  ;;  %v464_v23 = vadd.f32 %v3743_v18, %v3728_v10  ;;  %v3882_v18 = vld [vmem:[#allocation5 + $0x154] ss:$12 sps:$4 sm:$0xff]   ;;  %v3890_v11 = vld [vmem:[#allocation5 + $0x158] ss:$12 sps:$4 sm:$0xff]  }
 0x1b0   :  { %3267 = vpow2.f32 %v2599_v12  ;;  %v4638_v12 = vmov 0.0  }
 0x1bb   :  { %v3266_v1 = vpop.eup %3265 }
 0x1bc   :  { %v724_v19 = vadd.f32 1.0, %v3266_v1  ;;  %v3894_v1 = vld [vmem:[#allocation5 + $0x13c] ss:$12 sps:$4 sm:$0xff]  }
 0x1bd   :  { %v3268_v9 = vpop.eup %3267 }
 0x1be   :  { %3269 = vrcp.f32 %v724_v19  ;;  %v731_v22 = vadd.f32 1.0, %v3268_v9  ;;  %v3876_v9 = vld [vmem:[#allocation5 + $0x170] ss:$12 sps:$4 sm:$0xff]  }
 0x1c0   :  { %3271 = vrcp.f32 %v731_v22  ;;  %v4639_v22 = vmov 0  }
 0x1cb   :  { %v3270_v29 = vpop.eup %3269 }
 0x1cc   :  { %v734_v20 = vmul.f32 %v3270_v29, %v715_v27  ;;  %v3901_v27 = vld [vmem:[#allocation5 + $0x138] ss:$12 sps:$4 sm:$0xff]   ;;  %v3903_v29 = vld [vmem:[#allocation5 + $0x140] ss:$12 sps:$4 sm:$0xff]  }
 0x1cd   :  { %v3272_v6 = vpop.eup %3271 }
 0x1ce   :  { %v735_v13 = vadd.f32 %v734_v20, %v464_v23  ;;  %v737_v17 = vsub.f32 1.0, %v3272_v6  ;;  %v739_v19 = vmul.f32 %v3272_v6, %v3706_v61  ;;  %v3907_v23 = vld [vmem:[#allocation5 + $0x124] ss:$12 sps:$4 sm:$0xff]   ;;  %v3911_v20 = vld [vmem:[#allocation5 + $0x120] ss:$12 sps:$4 sm:$0xff]  }
 0x1cf   :  { %4640 = vst [vmem:[#allocation47_spill] sm:$0xff] %v3911_v20  ;;  %v3917_v6 = vld [vmem:[#allocation5 + $0x10c] ss:$12 sps:$4 sm:$0xff]  }
 0x1d0   :  { %3273 = vtanh.f32 %v735_v13  ;;  %v3913_v13 = vld [vmem:[#allocation5 + $0x128] ss:$12 sps:$4 sm:$0xff]   ;;  %4642 = vst [vmem:[#allocation49_spill] sm:$0xff] %v3917_v6 }
 0x1d1   :  { %4641 = vst [vmem:[#allocation48_spill] sm:$0xff] %v3913_v13 }
 0x1dd   :  { %v3274_v21 = vpop.eup %3273 }
 0x1de   :  { %v738_v24 = vmul.f32 %v3274_v21, %v737_v17  ;;  %v3921_v17 = vld [vmem:[#allocation5 + $0x108] ss:$12 sps:$4 sm:$0xff]   ;;  %v3923_v21 = vld [vmem:[#allocation5 + $0x110] ss:$12 sps:$4 sm:$0xff]  }
 0x1df   :  { %4643 = vst [vmem:[#allocation50_spill] sm:$0xff] %v3921_v17  ;;  %4644 = vst [vmem:[#allocation51_spill] sm:$0xff] %v3923_v21 }
 0x1e0   :  { %v3872_v26 = vadd.f32 %v739_v19, %v738_v24  ;;  %v3927_v24 = vld [vmem:[#allocation5 + $0xf4] ss:$12 sps:$4 sm:$0xff]   ;;  %v3931_v19 = vld [vmem:[#allocation5 + $0xf0] ss:$12 sps:$4 sm:$0xff]  }
 0x1e1   :  { %4645 = vst [vmem:[#allocation52_spill] sm:$0xff] %v3927_v24 }
 0x1e2   :  { %v3880_v4 = vpack.c.bf16 %v3872_v26, %v3872_v26 }
 0x1e4   :  { %936 = vmatmul.mubr.bf16.vlgmr.msra.gmra.mxu1 %v3880_v4  ;;  %2877 = vmatmul.mubr.bf16.vlgmr.msra.gmra.mxu0 %v3880_v4 }
 0x1e5   :  { %1146 = vmatpush1.bf16.msra.mxu1 %v3874_v25  ;;  %2881 = vmatpush3.bf16.msra.mxu0 %v3876_v9 }
 0x1e6   :  { %1147 = vmatprep.subr.bf16.mxu1 %v3882_v18  ;;  %2882 = vmatprep.subr.bf16.mxu0 %v4638_v12 }
 0x1e7   :  { %1177 = vmatprep.mubr.bf16.mxu1 %v4639_v22  ;;  %2896 = vmatprep.mubr.msk.bf16.mxu0 %vm3504_vm0, %v4638_v12 }
 0x1e9   :  { %1148 = vmatpush1.bf16.msra.mxu1 %v3888_v28  ;;  %2883 = vmatpush3.bf16.msra.mxu0 %v3890_v11 }
 0x1ea   :  { %1149 = vmatprep.subr.bf16.mxu1 %v3894_v1  ;;  %2884 = vmatprep.subr.bf16.mxu0 %v4638_v12 }
 0x1ed   :  { %1150 = vmatpush1.bf16.msra.mxu1 %v3901_v27  ;;  %2885 = vmatpush3.bf16.msra.mxu0 %v3903_v29 }
 0x1ee   :  { %1151 = vmatprep.subr.bf16.mxu1 %v3907_v23  ;;  %2886 = vmatprep.subr.bf16.mxu0 %v4638_v12 }
 0x1f1   :  { %1152 = vmatpush1.bf16.msra.mxu1 %v3911_v20  ;;  %2887 = vmatpush3.bf16.msra.mxu0 %v3913_v13  ;;  %v3937_v13 = vld [vmem:[#allocation5 + $0xdc] ss:$12 sps:$4 sm:$0xff]   ;;  %v3943_v20 = vld [vmem:[#allocation5 + $0xe0] ss:$12 sps:$4 sm:$0xff]  }
 0x1f2   :  { %1153 = vmatprep.subr.bf16.mxu1 %v3917_v6  ;;  %2888 = vmatprep.subr.bf16.mxu0 %v4638_v12  ;;  %v3941_v6 = vld [vmem:[#allocation5 + $0xd8] ss:$12 sps:$4 sm:$0xff]  }
 0x1f5   :  { %1154 = vmatpush1.bf16.msra.mxu1 %v3921_v17  ;;  %2889 = vmatpush3.bf16.msra.mxu0 %v3923_v21  ;;  %v3947_v21 = vld [vmem:[#allocation5 + $0xc4] ss:$12 sps:$4 sm:$0xff]   ;;  %v3953_v17 = vld [vmem:[#allocation5 + $0xc8] ss:$12 sps:$4 sm:$0xff]  }
 0x1f6   :  { %1155 = vmatprep.subr.bf16.mxu1 %v3927_v24  ;;  %2890 = vmatprep.subr.bf16.mxu0 %v4638_v12  ;;  %v3951_v24 = vld [vmem:[#allocation5 + $0xc0] ss:$12 sps:$4 sm:$0xff]  }
 0x1f9   :  { %1156 = vmatpush1.bf16.msra.mxu1 %v3931_v19  ;;  %2891 = vmatpush3.bf16.msra.mxu0 %v3933_v15 }
 0x1fa   :  { %1157 = vmatprep.subr.bf16.mxu1 %v3937_v13  ;;  %2892 = vmatprep.subr.bf16.mxu0 %v4638_v12 }
 0x1fd   :  { %1158 = vmatpush1.bf16.msra.mxu1 %v3941_v6  ;;  %2893 = vmatpush3.bf16.msra.mxu0 %v3943_v20 }
 0x1fe   :  { %1159 = vmatprep.subr.bf16.mxu1 %v3947_v21  ;;  %2894 = vmatprep.subr.bf16.mxu0 %v4638_v12 }
 0x201   :  { %1160 = vmatpush1.bf16.msra.mxu1 %v3951_v24  ;;  %2895 = vmatpush3.bf16.msra.mxu0 %v3953_v17 }
 0x202   :  { %1247 = vmatprep.subr.bf16.mxu1 %v3612_v32  ;;  %2900 = vmatprep.subr.bf16.mxu0 %v4638_v12  ;;  %v4646_v32 = vld [vmem:[#allocation32_spill] sm:$0xff] }
 0x204   :  { %1178 = vmatmul.mubr.bf16.vlgmr.msra.gmra.mxu1 %v3710_v63  ;;  %2897 = vmatmul.mubr.bf16.vlgmr.msra.gmra.mxu0 %v3710_v63 }
 0x205   :  { %1248 = vmatpush1.bf16.msra.mxu1 %v3620_v35  ;;  %2901 = vmatpush3.bf16.msra.mxu0 %v3625_v38  ;;  %v4647_v35 = vld [vmem:[#allocation33_spill] sm:$0xff]  ;;  %v4649_v38 = vld [vmem:[#allocation35_spill] sm:$0xff] }
 0x206   :  { %1249 = vmatprep.subr.bf16.mxu1 %v3623_v37  ;;  %2902 = vmatprep.subr.bf16.mxu0 %v4638_v12  ;;  %v4648_v37 = vld [vmem:[#allocation34_spill] sm:$0xff] }
 0x207   :  { %1279 = vmatprep.mubr.bf16.mxu1 %v4639_v22  ;;  %2916 = vmatprep.mubr.msk.bf16.mxu0 %vm3504_vm0, %v4638_v12 }
 0x209   :  { %1250 = vmatpush1.bf16.msra.mxu1 %v3628_v39  ;;  %2903 = vmatpush3.bf16.msra.mxu0 %v3631_v40  ;;  %v4650_v39 = vld [vmem:[#allocation36_spill] sm:$0xff]  ;;  %v4651_v40 = vld [vmem:[#allocation37_spill] sm:$0xff] }
 0x20a   :  { %1251 = vmatprep.subr.bf16.mxu1 %v3633_v41  ;;  %2904 = vmatprep.subr.bf16.mxu0 %v4638_v12  ;;  %v4652_v41 = vld [vmem:[#allocation38_spill] sm:$0xff] }
 0x20d   :  { %1252 = vmatpush1.bf16.msra.mxu1 %v3638_v42  ;;  %2905 = vmatpush3.bf16.msra.mxu0 %v3646_v44  ;;  %v4653_v42 = vld [vmem:[#allocation39_spill] sm:$0xff]  ;;  %v4655_v44 = vld [vmem:[#allocation41_spill] sm:$0xff] }
 0x20e   :  { %1253 = vmatprep.subr.bf16.mxu1 %v3643_v43  ;;  %2906 = vmatprep.subr.bf16.mxu0 %v4638_v12  ;;  %v4654_v43 = vld [vmem:[#allocation40_spill] sm:$0xff] }
 0x211   :  { %1254 = vmatpush1.bf16.msra.mxu1 %v3650_v45  ;;  %2907 = vmatpush3.bf16.msra.mxu0 %v3656_v47  ;;  %v4656_v45 = vld [vmem:[#allocation42_spill] sm:$0xff] }
 0x212   :  { %1255 = vmatprep.subr.bf16.mxu1 %v3653_v46  ;;  %2908 = vmatprep.subr.bf16.mxu0 %v4638_v12  ;;  %v4657_v46 = vld [vmem:[#allocation43_spill] sm:$0xff] }
 0x215   :  { %1256 = vmatpush1.bf16.msra.mxu1 %v3661_v48  ;;  %2909 = vmatpush3.bf16.msra.mxu0 %v3667_v50 }
 0x216   :  { %1257 = vmatprep.subr.bf16.mxu1 %v3664_v49  ;;  %2910 = vmatprep.subr.bf16.mxu0 %v4638_v12 }
 0x219   :  { %1258 = vmatpush1.bf16.msra.mxu1 %v3671_v51  ;;  %2911 = vmatpush3.bf16.msra.mxu0 %v3677_v53 }
 0x21a   :  { %1259 = vmatprep.subr.bf16.mxu1 %v3674_v52  ;;  %2912 = vmatprep.subr.bf16.mxu0 %v4638_v12 }
 0x21d   :  { %1260 = vmatpush1.bf16.msra.mxu1 %v3681_v54  ;;  %2913 = vmatpush3.bf16.msra.mxu0 %v3685_v55 }
 0x21e   :  { %1261 = vmatprep.subr.bf16.mxu1 %v3693_v56  ;;  %2914 = vmatprep.subr.bf16.mxu0 %v4638_v12 }
 0x221   :  { %1262 = vmatpush1.bf16.msra.mxu1 %v3695_v57  ;;  %2915 = vmatpush3.bf16.msra.mxu0 %v3697_v58 }
 0x222   :  { %1350 = vmatprep.subr.bf16.mxu1 %v3763_v30  ;;  %2920 = vmatprep.subr.bf16.mxu0 %v4638_v12 }
 0x224   :  { %1280 = vmatmul.mubr.bf16.vlgmr.msra.gmra.mxu1 %v3880_v4  ;;  %2917 = vmatmul.mubr.bf16.vlgmr.msra.gmra.mxu0 %v3880_v4 }
 0x225   :  { %1351 = vmatpush1.bf16.msra.mxu1 %v3765_v31  ;;  %2921 = vmatpush3.bf16.msra.mxu0 %v3767_v33 }
 0x226   :  { %1352 = vmatprep.subr.bf16.mxu1 %v3772_v34  ;;  %2922 = vmatprep.subr.bf16.mxu0 %v4638_v12 }
 0x227   :  { %1382 = vmatprep.mubr.bf16.mxu1 %v4639_v22  ;;  %2936 = vmatprep.mubr.msk.bf16.mxu0 %vm3504_vm0, %v4638_v12 }
 0x229   :  { %1353 = vmatpush1.bf16.msra.mxu1 %v3775_v36  ;;  %2923 = vmatpush3.bf16.msra.mxu0 %v3777_v59 }
 0x22a   :  { %1354 = vmatprep.subr.bf16.mxu1 %v3782_v60  ;;  %2924 = vmatprep.subr.bf16.mxu0 %v4638_v12 }
 0x22d   :  { %1355 = vmatpush1.bf16.msra.mxu1 %v3785_v62  ;;  %2925 = vmatpush3.bf16.msra.mxu0 %v3787_v2 }
 0x22e   :  { %1356 = vmatprep.subr.bf16.mxu1 %v3792_v3  ;;  %2926 = vmatprep.subr.bf16.mxu0 %v4638_v12 }
 0x231   :  { %1357 = vmatpush1.bf16.msra.mxu1 %v3795_v5  ;;  %2927 = vmatpush3.bf16.msra.mxu0 %v3797_v8 }
 0x232   :  { %1358 = vmatprep.subr.bf16.mxu1 %v3802_v14  ;;  %2928 = vmatprep.subr.bf16.mxu0 %v4638_v12 }
 0x235   :  { %1359 = vmatpush1.bf16.msra.mxu1 %v4646_v32  ;;  %2929 = vmatpush3.bf16.msra.mxu0 %v4647_v35  ;;  %v4661_v35 = vld [vmem:[#allocation12_spill] sm:$0xff] }
 0x236   :  { %1360 = vmatprep.subr.bf16.mxu1 %v4648_v37  ;;  %2930 = vmatprep.subr.bf16.mxu0 %v4638_v12 }
 0x239   :  { %1361 = vmatpush1.bf16.msra.mxu1 %v4649_v38  ;;  %2931 = vmatpush3.bf16.msra.mxu0 %v4650_v39 }
 0x23a   :  { %1362 = vmatprep.subr.bf16.mxu1 %v4651_v40  ;;  %2932 = vmatprep.subr.bf16.mxu0 %v4638_v12 }
 0x23d   :  { %1363 = vmatpush1.bf16.msra.mxu1 %v4652_v41  ;;  %2933 = vmatpush3.bf16.msra.mxu0 %v4653_v42 }
 0x23e   :  { %1364 = vmatprep.subr.bf16.mxu1 %v4654_v43  ;;  %2934 = vmatprep.subr.bf16.mxu0 %v4638_v12  ;;  %v2548_v43 = vld [vmem:[%s4520_s5 + $0x3] sm:$0x7]  ;;  %s2533_s5 = sshll.u32 %s3506_s3, 4  ;;  %s2534_s5 = int_to_ptr.vmem [resolvable:$true] %s2533_s5 }
 0x23f   :  { %s3473_s4 = scalar_lea.vmem %s2534_s5, 16  ;;  %p3478_p11 = scmp.lt.s32.totalorder %s2534_s5, %s2534_s5 }
 0x240   :  { %p3474_p10 = scmp.ne.s32.totalorder %s2534_s5, %s3473_s4 }
 0x241   :  { %1365 = vmatpush1.bf16.msra.mxu1 %v4655_v44  ;;  %2935 = vmatpush3.bf16.msra.mxu0 %v4656_v45  ;;  %v2549_v45 = vld [vmem:[%s4521_s6 + $0x3] sm:$0x7] }
 0x242   :  { %1432 = vmatprep.subr.bf16.mxu1 %v4657_v46  ;;  %2940 = vmatprep.subr.bf16.mxu0 %v4638_v12  ;;  %v4658_v44 = vld [vmem:[#allocation11_spill] sm:$0xff] }
 0x243   :  { %v4042_v46 = vrot.slane %v2548_v43, %v4658_v44  ;;  %v4045_v37 = vrot.slane %v2549_v45, %v4658_v44 }
 0x245   :  { %4659 = vst [vmem:[#allocation11_spill] sm:$0xff] %v4042_v46  ;;  %4660 = vst [vmem:[#allocation53_spill] sm:$0xff] %v4045_v37 }
 0x2a4   :  { %v937_v47 = vpop.f32.mrf.mxu1  ;;  %v978_v63 = vpop.f32.mrf.mxu0 }
 0x2a6   :  { %v939_v4 = vpop.f32.mrf.mxu1  ;;  %v2878_v40 = vpop.f32.mrf.mxu0 }
 0x2a7   :  { %v4048_v40 = vrot.slane %v2548_v43, %v4661_v35 }
 0x2a8   :  { %v941_v39 = vpop.f32.mrf.mxu1  ;;  %v981_v41 = vpop.f32.mrf.mxu0 }
 0x2a9   :  { %v940_v5 = vadd.f32 %v939_v4, %v4048_v40 }
 0x2aa   :  { %v942_v38 = vpop.f32.mrf.mxu1  ;;  %v2879_v42 = vpop.f32.mrf.mxu0 }
 0x2ab   :  { %v4051_v38 = vrot.slane %v2549_v45, %v4661_v35  ;;  %v938_v42 = vadd.f32 %v937_v47, %v4042_v46 }
 0x2ad   :  { %4662 = vst [vmem:[#allocation12_spill] sm:$0xff] %v4051_v38 }
 0x2c4   :  { %v1179_v39 = vpop.f32.mrf.mxu1  ;;  %v1220_v41 = vpop.f32.mrf.mxu0 }
 0x2c5   :  { %v1180_v32 = vadd.f32 %v1179_v39, %v4045_v37 }
 0x2c6   :  { %v1181_v14 = vpop.f32.mrf.mxu1  ;;  %v2898_v8 = vpop.f32.mrf.mxu0 }
 0x2c7   :  { %v1226_v3 = vadd.f32 %v1180_v32, %v938_v42  ;;  %v1182_v44 = vadd.f32 %v1181_v14, %v4051_v38  ;;  %v4058_v8 = vrot.slane %v2549_v45, %v3720_v7  ;;  %v4061_v32 = vrot.slane %v2548_v43, %v3720_v7 }
 0x2c8   :  { %v1183_v2 = vpop.f32.mrf.mxu1  ;;  %v1223_v62 = vpop.f32.mrf.mxu0 }
 0x2c9   :  { %v2648_v60 = vmul.f32 -1.442695, %v1226_v3  ;;  %v1233_v59 = vadd.f32 %v1182_v44, %v940_v5  ;;  %4663 = vst [vmem:[#allocation54_spill] sm:$0xff] %v4058_v8  ;;  %v4664_v3 = vld [vmem:[#allocation45_spill] sm:$0xff]  ;;  %v979_v42 = vadd.f32 %v978_v63, %v4061_v32 }
 0x2ca   :  { %v1184_v36 = vpop.f32.mrf.mxu1  ;;  %v2899_v35 = vpop.f32.mrf.mxu0 }
 0x2cb   :  { %3275 = vpow2.f32 %v2648_v60  ;;  %v2649_v34 = vmul.f32 -1.442695, %v1233_v59  ;;  %v1221_v59 = vadd.f32 %v1220_v41, %v4058_v8 }
 0x2cd   :  { %3277 = vpow2.f32 %v2649_v34  ;;  %v4665_v34 = vld [vmem:[#allocation15_spill] sm:$0xff] }
 0x2d8   :  { %v3276_v33 = vpop.eup %3275 }
 0x2d9   :  { %v1230_v47 = vadd.f32 1.0, %v3276_v33 }
 0x2da   :  { %v3278_v39 = vpop.eup %3277 }
 0x2db   :  { %3279 = vrcp.f32 %v1230_v47  ;;  %v1237_v62 = vadd.f32 1.0, %v3278_v39 }
 0x2dd   :  { %3281 = vrcp.f32 %v1237_v62 }
 0x2e4   :  { %v1281_v14 = vpop.f32.mrf.mxu1  ;;  %v1322_v2 = vpop.f32.mrf.mxu0 }
 0x2e5   :  { %v1282_v5 = vadd.f32 %v1281_v14, %v4664_v3  ;;  %v4666_v14 = vld [vmem:[#allocation16_spill] sm:$0xff] }
 0x2e6   :  { %v1283_v36 = vpop.f32.mrf.mxu1  ;;  %v2918_v4 = vpop.f32.mrf.mxu0 }
 0x2e7   :  { %v1328_v60 = vadd.f32 %v1282_v5, %v4665_v34  ;;  %v1284_v43 = vadd.f32 %v1283_v36, %v3860_v0 }
 0x2e8   :  { %v3280_v33 = vpop.eup %3279  ;;  %v1285_v44 = vpop.f32.mrf.mxu1 }
 0x2e9   :  { %v1325_v45 = vpop.f32.mrf.mxu0  ;;  %v1240_v35 = vmul.f32 %v3280_v33, %v1221_v59  ;;  %v2650_v7 = vmul.f32 -1.442695, %v1328_v60  ;;  %v1335_v4 = vadd.f32 %v1284_v43, %v4666_v14 }
 0x2ea   :  { %v1286_v47 = vpop.f32.mrf.mxu1  ;;  %v3282_v5 = vpop.eup %3281  ;;  %v4667_v45 = vld [vmem:[#allocation44_spill] sm:$0xff] }
 0x2eb   :  { %v2919_v39 = vpop.f32.mrf.mxu0  ;;  %v1241_v38 = vadd.f32 %v1240_v35, %v979_v42  ;;  %3283 = vpow2.f32 %v2650_v7  ;;  %v2651_v41 = vmul.f32 -1.442695, %v1335_v4  ;;  %v1243_v63 = vsub.f32 1.0, %v3282_v5 }
 0x2ec   :  { %v1245_v62 = vmul.f32 %v3282_v5, %v3706_v61  ;;  %v1323_v42 = vadd.f32 %v1322_v2, %v3866_v16  ;;  %v467_v35 = vadd.f32 %v4667_v45, %v3728_v10  ;;  %v4668_v10 = vld [vmem:[#allocation47_spill] sm:$0xff]  ;;  %v4670_v2 = vld [vmem:[#allocation49_spill] sm:$0xff]  ;;  %v4671_v5 = vld [vmem:[#allocation50_spill] sm:$0xff] }
 0x2ed   :  { %3285 = vtanh.f32 %v1241_v38  ;;  %v4142_v45 = vld [vmem:[#allocation5 + $0x7c] ss:$12 sps:$4 sm:$0xff]  }
 0x2ee   :  { %3287 = vpow2.f32 %v2651_v41 }
 0x2f8   :  { %v3284_v34 = vpop.eup %3283 }
 0x2f9   :  { %v1332_v8 = vadd.f32 1.0, %v3284_v34  ;;  %v4672_v34 = vld [vmem:[#allocation51_spill] sm:$0xff] }
 0x2fa   :  { %v3286_v44 = vpop.eup %3285 }
 0x2fb   :  { %3289 = vrcp.f32 %v1332_v8  ;;  %v1244_v59 = vmul.f32 %v3286_v44, %v1243_v63  ;;  %v3288_v36 = vpop.eup %3287  ;;  %v4673_v63 = vld [vmem:[#allocation52_spill] sm:$0xff] }
 0x2fc   :  { %v1339_v33 = vadd.f32 1.0, %v3288_v36  ;;  %v4126_v36 = vld [vmem:[#allocation5 + $0xb0] ss:$12 sps:$4 sm:$0xff]  }
 0x2fd   :  { %v4070_v60 = vadd.f32 %v1245_v62, %v1244_v59  ;;  %v4119_v59 = vld [vmem:[#allocation5 + $0xac] ss:$12 sps:$4 sm:$0xff]   ;;  %v4123_v62 = vld [vmem:[#allocation5 + $0xa8] ss:$12 sps:$4 sm:$0xff]  }
 0x2fe   :  { %3291 = vrcp.f32 %v1339_v33  ;;  %v4129_v33 = vld [vmem:[#allocation5 + $0x94] ss:$12 sps:$4 sm:$0xff]  }
 0x2ff   :  { %v1431_v44 = vpack.c.bf16 %v4070_v60, %v4070_v60 }
 0x308   :  { %v3290_v38 = vpop.eup %3289 }
 0x309   :  { %v1342_v7 = vmul.f32 %v3290_v38, %v1323_v42  ;;  %v4136_v42 = vld [vmem:[#allocation5 + $0x90] ss:$12 sps:$4 sm:$0xff]   ;;  %v4139_v38 = vld [vmem:[#allocation5 + $0x98] ss:$12 sps:$4 sm:$0xff]  }
 0x30b   :  { %v1343_v43 = vadd.f32 %v1342_v7, %v467_v35  ;;  %v3292_v47 = vpop.eup %3291  ;;  %v4146_v35 = vld [vmem:[#allocation5 + $0x78] ss:$12 sps:$4 sm:$0xff]   ;;  %v4149_v7 = vld [vmem:[#allocation5 + $0x80] ss:$12 sps:$4 sm:$0xff]  }
 0x30c   :  { %v1345_v39 = vsub.f32 1.0, %v3292_v47  ;;  %v1347_v61 = vmul.f32 %v3292_v47, %v3872_v26  ;;  %v4669_v26 = vld [vmem:[#allocation48_spill] sm:$0xff] }
 0x30d   :  { %3293 = vtanh.f32 %v1343_v43  ;;  %v4152_v43 = vld [vmem:[#allocation5 + $0x64] ss:$12 sps:$4 sm:$0xff]   ;;  %v4156_v47 = vld [vmem:[#allocation5 + $0x60] ss:$12 sps:$4 sm:$0xff]  }
 0x30e   :  { %4674 = vst [vmem:[#allocation45_spill] sm:$0xff] %v4152_v43  ;;  %4675 = vst [vmem:[#allocation15_spill] sm:$0xff] %v4156_v47 }
 0x31a   :  { %v3294_v8 = vpop.eup %3293 }
 0x31b   :  { %v1346_v14 = vmul.f32 %v3294_v8, %v1345_v39  ;;  %v4159_v39 = vld [vmem:[#allocation5 + $0x68] ss:$12 sps:$4 sm:$0xff]   ;;  %v4162_v8 = vld [vmem:[#allocation5 + $0x4c] ss:$12 sps:$4 sm:$0xff]  }
 0x31c   :  { %4676 = vst [vmem:[#allocation16_spill] sm:$0xff] %v4159_v39  ;;  %4677 = vst [vmem:[#allocation44_spill] sm:$0xff] %v4162_v8 }
 0x31d   :  { %v4076_v4 = vadd.f32 %v1347_v61, %v1346_v14  ;;  %v4691_v14 = vld [vmem:[#allocation34_spill] sm:$0xff]  ;;  %v4692_v61 = vld [vmem:[#allocation35_spill] sm:$0xff] }
 0x31f   :  { %v4080_v41 = vpack.c.bf16 %v4076_v4, %v4076_v4 }
 0x321   :  { %1383 = vmatmul.mubr.bf16.vlgmr.msra.gmra.mxu1 %v4080_v41  ;;  %2937 = vmatmul.mubr.bf16.vlgmr.msra.gmra.mxu0 %v4080_v41 }
 0x322   :  { %1433 = vmatpush1.bf16.msra.mxu1 %v3874_v25  ;;  %2941 = vmatpush3.bf16.msra.mxu0 %v3876_v9 }
 0x323   :  { %1434 = vmatprep.subr.bf16.mxu1 %v3882_v18  ;;  %2942 = vmatprep.subr.bf16.mxu0 %v4638_v12 }
 0x324   :  { %1464 = vmatprep.mubr.bf16.mxu1 %v4639_v22  ;;  %2956 = vmatprep.mubr.msk.bf16.mxu0 %vm3504_vm0, %v4638_v12 }
 0x326   :  { %1435 = vmatpush1.bf16.msra.mxu1 %v3888_v28  ;;  %2943 = vmatpush3.bf16.msra.mxu0 %v3890_v11 }
 0x327   :  { %1436 = vmatprep.subr.bf16.mxu1 %v3894_v1  ;;  %2944 = vmatprep.subr.bf16.mxu0 %v4638_v12 }
 0x32a   :  { %1437 = vmatpush1.bf16.msra.mxu1 %v3901_v27  ;;  %2945 = vmatpush3.bf16.msra.mxu0 %v3903_v29 }
 0x32b   :  { %1438 = vmatprep.subr.bf16.mxu1 %v3907_v23  ;;  %2946 = vmatprep.subr.bf16.mxu0 %v4638_v12 }
 0x32e   :  { %1439 = vmatpush1.bf16.msra.mxu1 %v4668_v10  ;;  %2947 = vmatpush3.bf16.msra.mxu0 %v4669_v26 }
 0x32f   :  { %1440 = vmatprep.subr.bf16.mxu1 %v4670_v2  ;;  %2948 = vmatprep.subr.bf16.mxu0 %v4638_v12 }
 0x332   :  { %1441 = vmatpush1.bf16.msra.mxu1 %v4671_v5  ;;  %2949 = vmatpush3.bf16.msra.mxu0 %v4672_v34 }
 0x333   :  { %1442 = vmatprep.subr.bf16.mxu1 %v4673_v63  ;;  %2950 = vmatprep.subr.bf16.mxu0 %v4638_v12 }
 0x336   :  { %1443 = vmatpush1.bf16.msra.mxu1 %v3931_v19  ;;  %2951 = vmatpush3.bf16.msra.mxu0 %v3933_v15 }
 0x337   :  { %1444 = vmatprep.subr.bf16.mxu1 %v3937_v13  ;;  %2952 = vmatprep.subr.bf16.mxu0 %v4638_v12 }
 0x33a   :  { %1445 = vmatpush1.bf16.msra.mxu1 %v3941_v6  ;;  %2953 = vmatpush3.bf16.msra.mxu0 %v3943_v20 }
 0x33b   :  { %1446 = vmatprep.subr.bf16.mxu1 %v3947_v21  ;;  %2954 = vmatprep.subr.bf16.mxu0 %v4638_v12 }
 0x33e   :  { %1447 = vmatpush1.bf16.msra.mxu1 %v3951_v24  ;;  %2955 = vmatpush3.bf16.msra.mxu0 %v3953_v17 }
 0x33f   :  { %1534 = vmatprep.subr.bf16.mxu1 %v4119_v59  ;;  %2960 = vmatprep.subr.bf16.mxu0 %v4638_v12 }
 0x341   :  { %1465 = vmatmul.mubr.bf16.vlgmr.msra.gmra.mxu1 %v1431_v44  ;;  %2957 = vmatmul.mubr.bf16.vlgmr.msra.gmra.mxu0 %v1431_v44  ;;  %v4694_v44 = vld [vmem:[#allocation37_spill] sm:$0xff] }
 0x342   :  { %1535 = vmatpush1.bf16.msra.mxu1 %v4123_v62  ;;  %2961 = vmatpush3.bf16.msra.mxu0 %v4126_v36 }
 0x343   :  { %1536 = vmatprep.subr.bf16.mxu1 %v4129_v33  ;;  %2962 = vmatprep.subr.bf16.mxu0 %v4638_v12 }
 0x344   :  { %1566 = vmatprep.mubr.bf16.mxu1 %v4639_v22  ;;  %2976 = vmatprep.mubr.msk.bf16.mxu0 %vm3504_vm0, %v4638_v12 }
 0x346   :  { %1537 = vmatpush1.bf16.msra.mxu1 %v4136_v42  ;;  %2963 = vmatpush3.bf16.msra.mxu0 %v4139_v38 }
 0x347   :  { %1538 = vmatprep.subr.bf16.mxu1 %v4142_v45  ;;  %2964 = vmatprep.subr.bf16.mxu0 %v4638_v12 }
 0x34a   :  { %1539 = vmatpush1.bf16.msra.mxu1 %v4146_v35  ;;  %2965 = vmatpush3.bf16.msra.mxu0 %v4149_v7 }
 0x34b   :  { %1540 = vmatprep.subr.bf16.mxu1 %v4152_v43  ;;  %2966 = vmatprep.subr.bf16.mxu0 %v4638_v12 }
 0x34e   :  { %1541 = vmatpush1.bf16.msra.mxu1 %v4156_v47  ;;  %2967 = vmatpush3.bf16.msra.mxu0 %v4159_v39 }
 0x34f   :  { %1542 = vmatprep.subr.bf16.mxu1 %v4162_v8  ;;  %2968 = vmatprep.subr.bf16.mxu0 %v4638_v12 }
 0x352   :  { %1543 = vmatpush1.bf16.msra.mxu1 %v3661_v48  ;;  %2969 = vmatpush3.bf16.msra.mxu0 %v3667_v50  ;;  %v4678_v48 = vld [vmem:[#allocation21_spill] sm:$0xff]  ;;  %v4680_v50 = vld [vmem:[#allocation23_spill] sm:$0xff] }
 0x353   :  { %1544 = vmatprep.subr.bf16.mxu1 %v3664_v49  ;;  %2970 = vmatprep.subr.bf16.mxu0 %v4638_v12  ;;  %v4679_v49 = vld [vmem:[#allocation22_spill] sm:$0xff] }
 0x356   :  { %1545 = vmatpush1.bf16.msra.mxu1 %v3671_v51  ;;  %2971 = vmatpush3.bf16.msra.mxu0 %v3677_v53  ;;  %v4681_v51 = vld [vmem:[#allocation24_spill] sm:$0xff]  ;;  %v4683_v53 = vld [vmem:[#allocation26_spill] sm:$0xff] }
 0x357   :  { %1546 = vmatprep.subr.bf16.mxu1 %v3674_v52  ;;  %2972 = vmatprep.subr.bf16.mxu0 %v4638_v12  ;;  %v4682_v52 = vld [vmem:[#allocation25_spill] sm:$0xff] }
 0x35a   :  { %1547 = vmatpush1.bf16.msra.mxu1 %v3681_v54  ;;  %2973 = vmatpush3.bf16.msra.mxu0 %v3685_v55  ;;  %v4684_v54 = vld [vmem:[#allocation27_spill] sm:$0xff]  ;;  %v4685_v55 = vld [vmem:[#allocation28_spill] sm:$0xff] }
 0x35b   :  { %1548 = vmatprep.subr.bf16.mxu1 %v3693_v56  ;;  %2974 = vmatprep.subr.bf16.mxu0 %v4638_v12  ;;  %v4686_v56 = vld [vmem:[#allocation29_spill] sm:$0xff] }
 0x35e   :  { %1549 = vmatpush1.bf16.msra.mxu1 %v3695_v57  ;;  %2975 = vmatpush3.bf16.msra.mxu0 %v3697_v58  ;;  %v4687_v57 = vld [vmem:[#allocation30_spill] sm:$0xff]  ;;  %v4688_v58 = vld [vmem:[#allocation31_spill] sm:$0xff] }
 0x35f   :  { %1637 = vmatprep.subr.bf16.mxu1 %v3763_v30  ;;  %2980 = vmatprep.subr.bf16.mxu0 %v4638_v12  ;;  %v4689_v30 = vld [vmem:[#allocation32_spill] sm:$0xff] }
 0x361   :  { %1567 = vmatmul.mubr.bf16.vlgmr.msra.gmra.mxu1 %v4080_v41  ;;  %2977 = vmatmul.mubr.bf16.vlgmr.msra.gmra.mxu0 %v4080_v41  ;;  %v4693_v41 = vld [vmem:[#allocation36_spill] sm:$0xff] }
 0x362   :  { %1638 = vmatpush1.bf16.msra.mxu1 %v3765_v31  ;;  %2981 = vmatpush3.bf16.msra.mxu0 %v4678_v48  ;;  %v4690_v31 = vld [vmem:[#allocation33_spill] sm:$0xff]  ;;  %v4695_v48 = vld [vmem:[#allocation38_spill] sm:$0xff] }
 0x363   :  { %1639 = vmatprep.subr.bf16.mxu1 %v4679_v49  ;;  %2982 = vmatprep.subr.bf16.mxu0 %v4638_v12  ;;  %v4696_v49 = vld [vmem:[#allocation39_spill] sm:$0xff] }
 0x364   :  { %1669 = vmatprep.mubr.bf16.mxu1 %v4639_v22  ;;  %2996 = vmatprep.mubr.msk.bf16.mxu0 %vm3504_vm0, %v4638_v12 }
 0x366   :  { %1640 = vmatpush1.bf16.msra.mxu1 %v4680_v50  ;;  %2983 = vmatpush3.bf16.msra.mxu0 %v4681_v51  ;;  %v4697_v50 = vld [vmem:[#allocation40_spill] sm:$0xff]  ;;  %v4698_v51 = vld [vmem:[#allocation41_spill] sm:$0xff] }
 0x367   :  { %1641 = vmatprep.subr.bf16.mxu1 %v4682_v52  ;;  %2984 = vmatprep.subr.bf16.mxu0 %v4638_v12  ;;  %v4699_v52 = vld [vmem:[#allocation42_spill] sm:$0xff] }
 0x36a   :  { %1642 = vmatpush1.bf16.msra.mxu1 %v4683_v53  ;;  %2985 = vmatpush3.bf16.msra.mxu0 %v4684_v54  ;;  %v4700_v53 = vld [vmem:[#allocation43_spill] sm:$0xff] }
 0x36b   :  { %1643 = vmatprep.subr.bf16.mxu1 %v4685_v55  ;;  %2986 = vmatprep.subr.bf16.mxu0 %v4638_v12 }
 0x36e   :  { %1644 = vmatpush1.bf16.msra.mxu1 %v4686_v56  ;;  %2987 = vmatpush3.bf16.msra.mxu0 %v4687_v57 }
 0x36f   :  { %1645 = vmatprep.subr.bf16.mxu1 %v4688_v58  ;;  %2988 = vmatprep.subr.bf16.mxu0 %v4638_v12 }
 0x372   :  { %1646 = vmatpush1.bf16.msra.mxu1 %v4689_v30  ;;  %2989 = vmatpush3.bf16.msra.mxu0 %v4690_v31 }
 0x373   :  { %1647 = vmatprep.subr.bf16.mxu1 %v4691_v14  ;;  %2990 = vmatprep.subr.bf16.mxu0 %v4638_v12 }
 0x376   :  { %1648 = vmatpush1.bf16.msra.mxu1 %v4692_v61  ;;  %2991 = vmatpush3.bf16.msra.mxu0 %v4693_v41 }
 0x377   :  { %1649 = vmatprep.subr.bf16.mxu1 %v4694_v44  ;;  %2992 = vmatprep.subr.bf16.mxu0 %v4638_v12 }
 0x37a   :  { %1650 = vmatpush1.bf16.msra.mxu1 %v4695_v48  ;;  %2993 = vmatpush3.bf16.msra.mxu0 %v4696_v49 }
 0x37b   :  { %1651 = vmatprep.subr.bf16.mxu1 %v4697_v50  ;;  %2994 = vmatprep.subr.bf16.mxu0 %v4638_v12 }
 0x37e   :  { %1652 = vmatpush1.bf16.msra.mxu1 %v4698_v51  ;;  %2995 = vmatpush3.bf16.msra.mxu0 %v4699_v52 }
 0x37f   :  { %1719 = vmatprep.subr.bf16.mxu1 %v4700_v53  ;;  %3000 = vmatprep.subr.bf16.mxu0 %v4638_v12  ;;  %v4701_v53 = vld [vmem:[#allocation12_spill] sm:$0xff] }
 0x3e1   :  { %v1384_v54 = vpop.f32.mrf.mxu1  ;;  %v1425_v55 = vpop.f32.mrf.mxu0 }
 0x3e2   :  { %v1385_v44 = vadd.f32 %v1384_v54, %v4042_v46 }
 0x3e3   :  { %v1386_v56 = vpop.f32.mrf.mxu1  ;;  %v2938_v57 = vpop.f32.mrf.mxu0 }
 0x3e4   :  { %v1387_v51 = vadd.f32 %v1386_v56, %v4048_v40 }
 0x3e5   :  { %v1388_v58 = vpop.f32.mrf.mxu1  ;;  %v1428_v30 = vpop.f32.mrf.mxu0 }
 0x3e7   :  { %v1389_v31 = vpop.f32.mrf.mxu1  ;;  %v2939_v14 = vpop.f32.mrf.mxu0 }
 0x401   :  { %v1466_v61 = vpop.f32.mrf.mxu1  ;;  %v1507_v41 = vpop.f32.mrf.mxu0 }
 0x402   :  { %v1467_v48 = vadd.f32 %v1466_v61, %v4045_v37 }
 0x403   :  { %v1468_v49 = vpop.f32.mrf.mxu1  ;;  %v2958_v50 = vpop.f32.mrf.mxu0 }
 0x404   :  { %v1513_v52 = vadd.f32 %v1467_v48, %v1385_v44  ;;  %v1469_v8 = vadd.f32 %v1468_v49, %v4701_v53  ;;  %v4703_v49 = vld [vmem:[#allocation18_spill] sm:$0xff] }
 0x405   :  { %v1470_v39 = vpop.f32.mrf.mxu1  ;;  %v1510_v47 = vpop.f32.mrf.mxu0 }
 0x406   :  { %v2652_v57 = vmul.f32 -1.442695, %v1513_v52  ;;  %v1520_v58 = vadd.f32 %v1469_v8, %v1387_v51  ;;  %v4702_v39 = vld [vmem:[#allocation54_spill] sm:$0xff]  ;;  %v1426_v52 = vadd.f32 %v1425_v55, %v4061_v32 }
 0x407   :  { %v1471_v30 = vpop.f32.mrf.mxu1  ;;  %v2959_v31 = vpop.f32.mrf.mxu0  ;;  %v1508_v47 = vadd.f32 %v1507_v41, %v4702_v39 }
 0x408   :  { %3295 = vpow2.f32 %v2652_v57  ;;  %v2653_v14 = vmul.f32 -1.442695, %v1520_v58 }
 0x40a   :  { %3297 = vpow2.f32 %v2653_v14 }
 0x415   :  { %v3296_v43 = vpop.eup %3295 }
 0x416   :  { %v1517_v54 = vadd.f32 1.0, %v3296_v43 }
 0x417   :  { %v3298_v61 = vpop.eup %3297 }
 0x418   :  { %3299 = vrcp.f32 %v1517_v54  ;;  %v1524_v46 = vadd.f32 1.0, %v3298_v61 }
 0x41a   :  { %3301 = vrcp.f32 %v1524_v46 }
 0x421   :  { %v1568_v37 = vpop.f32.mrf.mxu1  ;;  %v1609_v50 = vpop.f32.mrf.mxu0 }
 0x422   :  { %v1569_v56 = vadd.f32 %v1568_v37, %v4664_v3  ;;  %v4704_v37 = vld [vmem:[#allocation19_spill] sm:$0xff] }
 0x423   :  { %v1570_v44 = vpop.f32.mrf.mxu1  ;;  %v2978_v48 = vpop.f32.mrf.mxu0 }
 0x424   :  { %v1615_v8 = vadd.f32 %v1569_v56, %v4703_v49  ;;  %v1571_v31 = vadd.f32 %v1570_v44, %v3860_v0 }
 0x425   :  { %v3300_v51 = vpop.eup %3299  ;;  %v1572_v57 = vpop.f32.mrf.mxu1 }
 0x426   :  { %v1612_v58 = vpop.f32.mrf.mxu0  ;;  %v1527_v30 = vmul.f32 %v3300_v51, %v1508_v47  ;;  %v2654_v43 = vmul.f32 -1.442695, %v1615_v8  ;;  %v1622_v48 = vadd.f32 %v1571_v31, %v4704_v37 }
 0x427   :  { %v1573_v14 = vpop.f32.mrf.mxu1  ;;  %v3302_v56 = vpop.eup %3301 }
 0x428   :  { %v2979_v54 = vpop.f32.mrf.mxu0  ;;  %v1528_v61 = vadd.f32 %v1527_v30, %v1426_v52  ;;  %3303 = vpow2.f32 %v2654_v43  ;;  %v2655_v41 = vmul.f32 -1.442695, %v1622_v48  ;;  %v1530_v55 = vsub.f32 1.0, %v3302_v56  ;;  %v4705_v43 = vld [vmem:[#allocation14_spill] sm:$0xff] }
 0x429   :  { %v1532_v46 = vmul.f32 %v3302_v56, %v4070_v60  ;;  %v1610_v52 = vadd.f32 %v1609_v50, %v3866_v16  ;;  %v3402_v50 = vld [vmem:[#allocation2 + $0xf8] ss:$12 sps:$4 sm:$0xff]   ;;  %v3403_v56 = vld [vmem:[#allocation2 + $0xdc] ss:$12 sps:$4 sm:$0xff]  }
 0x42a   :  { %3305 = vtanh.f32 %v1528_v61 }
 0x42b   :  { %3307 = vpow2.f32 %v2655_v41 }
 0x435   :  { %v3304_v49 = vpop.eup %3303 }
 0x436   :  { %v1619_v39 = vadd.f32 1.0, %v3304_v49  ;;  %v3404_v49 = vld [vmem:[#allocation2 + $0xd8] ss:$12 sps:$4 sm:$0xff]  }
 0x437   :  { %v3306_v57 = vpop.eup %3305 }
 0x438   :  { %3309 = vrcp.f32 %v1619_v39  ;;  %v1531_v47 = vmul.f32 %v3306_v57, %v1530_v55  ;;  %v3308_v44 = vpop.eup %3307  ;;  %v3405_v55 = vld [vmem:[#allocation2 + $0xe0] ss:$12 sps:$4 sm:$0xff]   ;;  %v3406_v57 = vld [vmem:[#allocation2 + $0xc4] ss:$12 sps:$4 sm:$0xff]  }
 0x439   :  { %v1626_v51 = vadd.f32 1.0, %v3308_v44  ;;  %v3409_v44 = vld [vmem:[#allocation5 + $0x16c] ss:$12 sps:$4 sm:$0xff]  }
 0x43a   :  { %v4230_v8 = vadd.f32 %v1532_v46, %v1531_v47  ;;  %v3407_v47 = vld [vmem:[#allocation2 + $0xc0] ss:$12 sps:$4 sm:$0xff]   ;;  %v3408_v46 = vld [vmem:[#allocation2 + $0xc8] ss:$12 sps:$4 sm:$0xff]  }
 0x43b   :  { %3311 = vrcp.f32 %v1626_v51 }
 0x445   :  { %v3310_v58 = vpop.eup %3309 }
 0x446   :  { %v1629_v30 = vmul.f32 %v3310_v58, %v1610_v52 }
 0x448   :  { %v1630_v31 = vadd.f32 %v1629_v30, %v4705_v43  ;;  %v3312_v14 = vpop.eup %3311 }
 0x449   :  { %v1632_v54 = vsub.f32 1.0, %v3312_v14  ;;  %v1634_v39 = vmul.f32 %v3312_v14, %v4076_v4  ;;  %v3386_v4 = vld [vmem:[#allocation2 + $0x168] ss:$12 sps:$4 sm:$0xff]  }
 0x44a   :  { %3313 = vtanh.f32 %v1630_v31 }
 0x457   :  { %v3314_v61 = vpop.eup %3313 }
 0x458   :  { %v1633_v37 = vmul.f32 %v3314_v61, %v1632_v54 }
 0x45a   :  { %v4235_v48 = vadd.f32 %v1634_v39, %v1633_v37  ;;  %v4710_v39 = vld [vmem:[#allocation11_spill] sm:$0xff] }
 0x45c   :  { %v4239_v41 = vpack.c.bf16 %v4235_v48, %v4235_v48 }
 0x45e   :  { %1670 = vmatmul.mubr.bf16.vlgmr.msra.gmra.mxu1 %v4239_v41  ;;  %2997 = vmatmul.mubr.bf16.vlgmr.msra.gmra.mxu0 %v4239_v41 }
 0x45f   :  { %1720 = vmatpush1.bf16.msra.mxu1 %v3874_v25  ;;  %3001 = vmatpush3.bf16.msra.mxu0 %v3876_v9  ;;  %v1718_v25 = vpack.c.bf16 %v4230_v8, %v4230_v8  ;;  %v4707_v9 = vld [vmem:[#allocation15_spill] sm:$0xff] }
 0x460   :  { %1721 = vmatprep.subr.bf16.mxu1 %v3882_v18  ;;  %3002 = vmatprep.subr.bf16.mxu0 %v4638_v12  ;;  %v4708_v18 = vld [vmem:[#allocation16_spill] sm:$0xff] }
 0x461   :  { %1751 = vmatprep.mubr.bf16.mxu1 %v4639_v22  ;;  %3016 = vmatprep.mubr.msk.bf16.mxu0 %vm3504_vm0, %v4638_v12 }
 0x463   :  { %1722 = vmatpush1.bf16.msra.mxu1 %v3888_v28  ;;  %3003 = vmatpush3.bf16.msra.mxu0 %v3890_v11  ;;  %v4709_v28 = vld [vmem:[#allocation44_spill] sm:$0xff] }
 0x464   :  { %1723 = vmatprep.subr.bf16.mxu1 %v3894_v1  ;;  %3004 = vmatprep.subr.bf16.mxu0 %v4638_v12  ;;  %v3374_v11 = vld [vmem:[#allocation5 + $0x48] ss:$12 sps:$4 sm:$0xff]   ;;  %v3375_v1 = vld [vmem:[#allocation5 + $0x50] ss:$12 sps:$4 sm:$0xff]  }
 0x467   :  { %1724 = vmatpush1.bf16.msra.mxu1 %v3901_v27  ;;  %3005 = vmatpush3.bf16.msra.mxu0 %v3903_v29  ;;  %v3376_v27 = vld [vmem:[#allocation5 + $0x34] ss:$12 sps:$4 sm:$0xff]   ;;  %v3377_v29 = vld [vmem:[#allocation5 + $0x30] ss:$12 sps:$4 sm:$0xff]  }
 0x468   :  { %1725 = vmatprep.subr.bf16.mxu1 %v3907_v23  ;;  %3006 = vmatprep.subr.bf16.mxu0 %v4638_v12  ;;  %v3378_v23 = vld [vmem:[#allocation5 + $0x38] ss:$12 sps:$4 sm:$0xff]  }
 0x46b   :  { %1726 = vmatpush1.bf16.msra.mxu1 %v4668_v10  ;;  %3007 = vmatpush3.bf16.msra.mxu0 %v4669_v26  ;;  %v3387_v10 = vld [vmem:[#allocation2 + $0x170] ss:$12 sps:$4 sm:$0xff]   ;;  %v3388_v26 = vld [vmem:[#allocation2 + $0x154] ss:$12 sps:$4 sm:$0xff]  }
 0x46c   :  { %1727 = vmatprep.subr.bf16.mxu1 %v4670_v2  ;;  %3008 = vmatprep.subr.bf16.mxu0 %v4638_v12  ;;  %v3389_v2 = vld [vmem:[#allocation2 + $0x150] ss:$12 sps:$4 sm:$0xff]  }
 0x46f   :  { %1728 = vmatpush1.bf16.msra.mxu1 %v4671_v5  ;;  %3009 = vmatpush3.bf16.msra.mxu0 %v4672_v34  ;;  %v3390_v5 = vld [vmem:[#allocation2 + $0x158] ss:$12 sps:$4 sm:$0xff]   ;;  %v3391_v34 = vld [vmem:[#allocation2 + $0x13c] ss:$12 sps:$4 sm:$0xff]  }
 0x470   :  { %1729 = vmatprep.subr.bf16.mxu1 %v4673_v63  ;;  %3010 = vmatprep.subr.bf16.mxu0 %v4638_v12  ;;  %v3392_v63 = vld [vmem:[#allocation2 + $0x138] ss:$12 sps:$4 sm:$0xff]  }
 0x473   :  { %1730 = vmatpush1.bf16.msra.mxu1 %v3931_v19  ;;  %3011 = vmatpush3.bf16.msra.mxu0 %v3933_v15  ;;  %v4706_v15 = vld [vmem:[#allocation45_spill] sm:$0xff] }
 0x474   :  { %1731 = vmatprep.subr.bf16.mxu1 %v3937_v13  ;;  %3012 = vmatprep.subr.bf16.mxu0 %v4638_v12  ;;  %v3380_v13 = vld [vmem:[#allocation5 + $0x18] ss:$12 sps:$4 sm:$0xff]  }
 0x475   :  { %v3385_v19 = vld [vmem:[#allocation2 + $0x16c] ss:$12 sps:$4 sm:$0xff]  }
 0x477   :  { %1732 = vmatpush1.bf16.msra.mxu1 %v3941_v6  ;;  %3013 = vmatpush3.bf16.msra.mxu0 %v3943_v20  ;;  %v3379_v20 = vld [vmem:[#allocation5 + $0x1c] ss:$12 sps:$4 sm:$0xff]   ;;  %v3381_v6 = vld [vmem:[#allocation5 + $0x20] ss:$12 sps:$4 sm:$0xff]  }
 0x478   :  { %1733 = vmatprep.subr.bf16.mxu1 %v3947_v21  ;;  %3014 = vmatprep.subr.bf16.mxu0 %v4638_v12  ;;  %v3383_v21 = vld [vmem:[#allocation5] ss:$12 sps:$4 sm:$0xff]  }
 0x47b   :  { %1734 = vmatpush1.bf16.msra.mxu1 %v3951_v24  ;;  %3015 = vmatpush3.bf16.msra.mxu0 %v3953_v17  ;;  %v3382_v17 = vld [vmem:[#allocation5 + $0x4] ss:$12 sps:$4 sm:$0xff]   ;;  %v3384_v24 = vld [vmem:[#allocation5 + $0x8] ss:$12 sps:$4 sm:$0xff]  }
 0x47c   :  { %1821 = vmatprep.subr.bf16.mxu1 %v4119_v59  ;;  %3020 = vmatprep.subr.bf16.mxu0 %v4638_v12  ;;  %v3393_v59 = vld [vmem:[#allocation2 + $0x140] ss:$12 sps:$4 sm:$0xff]  }
 0x47e   :  { %1752 = vmatmul.mubr.bf16.vlgmr.msra.gmra.mxu1 %v1718_v25  ;;  %3017 = vmatmul.mubr.bf16.vlgmr.msra.gmra.mxu0 %v1718_v25  ;;  %v4711_v25 = vld [vmem:[#allocation53_spill] sm:$0xff] }
 0x47f   :  { %1822 = vmatpush1.bf16.msra.mxu1 %v4123_v62  ;;  %3021 = vmatpush3.bf16.msra.mxu0 %v4126_v36  ;;  %v3394_v62 = vld [vmem:[#allocation2 + $0x124] ss:$12 sps:$4 sm:$0xff]   ;;  %v3395_v36 = vld [vmem:[#allocation2 + $0x120] ss:$12 sps:$4 sm:$0xff]  }
 0x480   :  { %1823 = vmatprep.subr.bf16.mxu1 %v4129_v33  ;;  %3022 = vmatprep.subr.bf16.mxu0 %v4638_v12  ;;  %v3396_v33 = vld [vmem:[#allocation2 + $0x128] ss:$12 sps:$4 sm:$0xff]  }
 0x481   :  { %1853 = vmatprep.mubr.bf16.mxu1 %v4639_v22  ;;  %3036 = vmatprep.mubr.msk.bf16.mxu0 %vm3504_vm0, %v4638_v12 }
 0x483   :  { %1824 = vmatpush1.bf16.msra.mxu1 %v4136_v42  ;;  %3023 = vmatpush3.bf16.msra.mxu0 %v4139_v38  ;;  %v3397_v42 = vld [vmem:[#allocation2 + $0x10c] ss:$12 sps:$4 sm:$0xff]   ;;  %v3398_v38 = vld [vmem:[#allocation2 + $0x108] ss:$12 sps:$4 sm:$0xff]  }
 0x484   :  { %1825 = vmatprep.subr.bf16.mxu1 %v4142_v45  ;;  %3024 = vmatprep.subr.bf16.mxu0 %v4638_v12  ;;  %v3399_v45 = vld [vmem:[#allocation2 + $0x110] ss:$12 sps:$4 sm:$0xff]  }
 0x487   :  { %1826 = vmatpush1.bf16.msra.mxu1 %v4146_v35  ;;  %3025 = vmatpush3.bf16.msra.mxu0 %v4149_v7  ;;  %v3400_v35 = vld [vmem:[#allocation2 + $0xf4] ss:$12 sps:$4 sm:$0xff]   ;;  %v3401_v7 = vld [vmem:[#allocation2 + $0xf0] ss:$12 sps:$4 sm:$0xff]  }
 0x488   :  { %1827 = vmatprep.subr.bf16.mxu1 %v4706_v15  ;;  %3026 = vmatprep.subr.bf16.mxu0 %v4638_v12 }
 0x48b   :  { %1828 = vmatpush1.bf16.msra.mxu1 %v4707_v9  ;;  %3027 = vmatpush3.bf16.msra.mxu0 %v4708_v18 }
 0x48c   :  { %1829 = vmatprep.subr.bf16.mxu1 %v4709_v28  ;;  %3028 = vmatprep.subr.bf16.mxu0 %v4638_v12 }
 0x48f   :  { %1830 = vmatpush1.bf16.msra.mxu1 %v3374_v11  ;;  %3029 = vmatpush3.bf16.msra.mxu0 %v3375_v1 }
 0x490   :  { %1831 = vmatprep.subr.bf16.mxu1 %v3376_v27  ;;  %3030 = vmatprep.subr.bf16.mxu0 %v4638_v12 }
 0x493   :  { %1832 = vmatpush1.bf16.msra.mxu1 %v3377_v29  ;;  %3031 = vmatpush3.bf16.msra.mxu0 %v3378_v23 }
 0x494   :  { %1833 = vmatprep.subr.bf16.mxu1 %v3379_v20  ;;  %3032 = vmatprep.subr.bf16.mxu0 %v4638_v12 }
 0x497   :  { %1834 = vmatpush1.bf16.msra.mxu1 %v3380_v13  ;;  %3033 = vmatpush3.bf16.msra.mxu0 %v3381_v6 }
 0x498   :  { %1835 = vmatprep.subr.bf16.mxu1 %v3382_v17  ;;  %3034 = vmatprep.subr.bf16.mxu0 %v4638_v12 }
 0x49b   :  { %1836 = vmatpush1.bf16.msra.mxu1 %v3383_v21  ;;  %3035 = vmatpush3.bf16.msra.mxu0 %v3384_v24 }
 0x49c   :  { %1924 = vmatprep.subr.bf16.mxu1 %v3385_v19  ;;  %3040 = vmatprep.subr.bf16.mxu0 %v4638_v12 }
 0x49e   :  { %1854 = vmatmul.mubr.bf16.vlgmr.msra.gmra.mxu1 %v4239_v41  ;;  %3037 = vmatmul.mubr.bf16.vlgmr.msra.gmra.mxu0 %v4239_v41 }
 0x49f   :  { %1925 = vmatpush1.bf16.msra.mxu1 %v3386_v4  ;;  %3041 = vmatpush3.bf16.msra.mxu0 %v3387_v10 }
 0x4a0   :  { %1926 = vmatprep.subr.bf16.mxu1 %v3388_v26  ;;  %3042 = vmatprep.subr.bf16.mxu0 %v4638_v12 }
 0x4a1   :  { %1956 = vmatprep.mubr.bf16.mxu1 %v4639_v22  ;;  %3056 = vmatprep.mubr.msk.bf16.mxu0 %vm3504_vm0, %v4638_v12 }
 0x4a3   :  { %1927 = vmatpush1.bf16.msra.mxu1 %v3389_v2  ;;  %3043 = vmatpush3.bf16.msra.mxu0 %v3390_v5 }
 0x4a4   :  { %1928 = vmatprep.subr.bf16.mxu1 %v3391_v34  ;;  %3044 = vmatprep.subr.bf16.mxu0 %v4638_v12 }
 0x4a7   :  { %1929 = vmatpush1.bf16.msra.mxu1 %v3392_v63  ;;  %3045 = vmatpush3.bf16.msra.mxu0 %v3393_v59  ;;  %v4712_v63 = vld [vmem:[#allocation54_spill] sm:$0xff] }
 0x4a8   :  { %1930 = vmatprep.subr.bf16.mxu1 %v3394_v62  ;;  %3046 = vmatprep.subr.bf16.mxu0 %v4638_v12  ;;  %v4713_v62 = vld [vmem:[#allocation20_spill] sm:$0xff] }
 0x4ab   :  { %1931 = vmatpush1.bf16.msra.mxu1 %v3395_v36  ;;  %3047 = vmatpush3.bf16.msra.mxu0 %v3396_v33 }
 0x4ac   :  { %1932 = vmatprep.subr.bf16.mxu1 %v3397_v42  ;;  %3048 = vmatprep.subr.bf16.mxu0 %v4638_v12 }
 0x4af   :  { %1933 = vmatpush1.bf16.msra.mxu1 %v3398_v38  ;;  %3049 = vmatpush3.bf16.msra.mxu0 %v3399_v45 }
 0x4b0   :  { %1934 = vmatprep.subr.bf16.mxu1 %v3400_v35  ;;  %3050 = vmatprep.subr.bf16.mxu0 %v4638_v12 }
 0x4b3   :  { %1935 = vmatpush1.bf16.msra.mxu1 %v3401_v7  ;;  %3051 = vmatpush3.bf16.msra.mxu0 %v3402_v50 }
 0x4b4   :  { %1936 = vmatprep.subr.bf16.mxu1 %v3403_v56  ;;  %3052 = vmatprep.subr.bf16.mxu0 %v4638_v12 }
 0x4b7   :  { %1937 = vmatpush1.bf16.msra.mxu1 %v3404_v49  ;;  %3053 = vmatpush3.bf16.msra.mxu0 %v3405_v55  ;;  %v4714_v55 = vld [vmem:[#allocation13_spill] sm:$0xff] }
 0x4b8   :  { %1938 = vmatprep.subr.bf16.mxu1 %v3406_v57  ;;  %3054 = vmatprep.subr.bf16.mxu0 %v4638_v12 }
 0x4bb   :  { %1939 = vmatpush1.bf16.msra.mxu1 %v3407_v47  ;;  %3055 = vmatpush3.bf16.msra.mxu0 %v3408_v46 }
 0x4bc   :  { %2006 = vmatprep.subr.bf16.mxu1 %v3409_v44  ;;  %3060 = vmatprep.subr.bf16.mxu0 %v4638_v12 }
 0x51e   :  { %v1671_v51 = vpop.f32.mrf.mxu1  ;;  %v1712_v52 = vpop.f32.mrf.mxu0 }
 0x51f   :  { %v1672_v41 = vadd.f32 %v1671_v51, %v4710_v39  ;;  %v1713_v42 = vadd.f32 %v1712_v52, %v4061_v32 }
 0x520   :  { %v1673_v58 = vpop.f32.mrf.mxu1  ;;  %v2998_v30 = vpop.f32.mrf.mxu0 }
 0x521   :  { %v1674_v28 = vadd.f32 %v1673_v58, %v4048_v40 }
 0x522   :  { %v1675_v43 = vpop.f32.mrf.mxu1  ;;  %v1715_v31 = vpop.f32.mrf.mxu0 }
 0x524   :  { %v1676_v14 = vpop.f32.mrf.mxu1  ;;  %v2999_v54 = vpop.f32.mrf.mxu0 }
 0x53e   :  { %v1753_v61 = vpop.f32.mrf.mxu1  ;;  %v1794_v37 = vpop.f32.mrf.mxu0 }
 0x53f   :  { %v1754_v15 = vadd.f32 %v1753_v61, %v4711_v25  ;;  %v1795_v59 = vadd.f32 %v1794_v37, %v4712_v63 }
 0x540   :  { %v1755_v9 = vpop.f32.mrf.mxu1  ;;  %v3018_v18 = vpop.f32.mrf.mxu0 }
 0x541   :  { %v1800_v11 = vadd.f32 %v1754_v15, %v1672_v41  ;;  %v1756_v1 = vadd.f32 %v1755_v9, %v4701_v53  ;;  %v4716_v9 = vld [vmem:[#allocation17_spill] sm:$0xff] }
 0x542   :  { %v1757_v27 = vpop.f32.mrf.mxu1  ;;  %v1797_v29 = vpop.f32.mrf.mxu0 }
 0x543   :  { %v2656_v23 = vmul.f32 -1.442695, %v1800_v11  ;;  %v1807_v20 = vadd.f32 %v1756_v1, %v1674_v28 }
 0x544   :  { %v1758_v13 = vpop.f32.mrf.mxu1  ;;  %v3019_v6 = vpop.f32.mrf.mxu0 }
 0x545   :  { %3315 = vpow2.f32 %v2656_v23  ;;  %v2657_v17 = vmul.f32 -1.442695, %v1807_v20  ;;  %v3410_v13 = vld [vmem:[#allocation5 + $0x168] ss:$12 sps:$4 sm:$0xff]   ;;  %v3411_v6 = vld [vmem:[#allocation5 + $0x170] ss:$12 sps:$4 sm:$0xff]  }
 0x547   :  { %3317 = vpow2.f32 %v2657_v17  ;;  %v3413_v17 = vld [vmem:[#allocation5 + $0x150] ss:$12 sps:$4 sm:$0xff]  }
 0x552   :  { %v3316_v21 = vpop.eup %3315 }
 0x553   :  { %v1804_v24 = vadd.f32 1.0, %v3316_v21  ;;  %v3415_v21 = vld [vmem:[#allocation5 + $0x13c] ss:$12 sps:$4 sm:$0xff]  }
 0x554   :  { %v3318_v19 = vpop.eup %3317 }
 0x555   :  { %3319 = vrcp.f32 %v1804_v24  ;;  %v1811_v26 = vadd.f32 1.0, %v3318_v19  ;;  %v3416_v24 = vld [vmem:[#allocation5 + $0x138] ss:$12 sps:$4 sm:$0xff]   ;;  %v3417_v19 = vld [vmem:[#allocation5 + $0x140] ss:$12 sps:$4 sm:$0xff]  }
 0x557   :  { %3321 = vrcp.f32 %v1811_v26  ;;  %v3421_v26 = vld [vmem:[#allocation5 + $0x10c] ss:$12 sps:$4 sm:$0xff]  }
 0x55e   :  { %v1855_v4 = vpop.f32.mrf.mxu1  ;;  %v1896_v10 = vpop.f32.mrf.mxu0 }
 0x55f   :  { %v1856_v2 = vadd.f32 %v1855_v4, %v4664_v3  ;;  %v4715_v3 = vld [vmem:[#allocation46_spill] sm:$0xff]  ;;  %v1897_v37 = vadd.f32 %v1896_v10, %v3866_v16  ;;  %v3418_v4 = vld [vmem:[#allocation5 + $0x124] ss:$12 sps:$4 sm:$0xff]   ;;  %v3420_v10 = vld [vmem:[#allocation5 + $0x128] ss:$12 sps:$4 sm:$0xff]  }
 0x560   :  { %v1857_v5 = vpop.f32.mrf.mxu1  ;;  %v3038_v34 = vpop.f32.mrf.mxu0  ;;  %v427_v57 = vadd.f32 %v4715_v3, %v4714_v55  ;;  %v3412_v16 = vld [vmem:[#allocation5 + $0x154] ss:$12 sps:$4 sm:$0xff]   ;;  %v3259_v3 = vld [vmem:[%s4522_s7 + $0x8] sm:$0xff]  }
 0x561   :  { %v1902_v36 = vadd.f32 %v1856_v2, %v4713_v62  ;;  %v1858_v50 = vadd.f32 %v1857_v5, %v3860_v0  ;;  %v3422_v2 = vld [vmem:[#allocation5 + $0x108] ss:$12 sps:$4 sm:$0xff]   ;;  %v3423_v5 = vld [vmem:[#allocation5 + $0x110] ss:$12 sps:$4 sm:$0xff]   ;;  %v3426_v62 = vld [vmem:[#allocation5 + $0xf8] ss:$12 sps:$4 sm:$0xff]  }
 0x562   :  { %v3320_v33 = vpop.eup %3319  ;;  %v1859_v38 = vpop.f32.mrf.mxu1  ;;  %v3424_v34 = vld [vmem:[#allocation5 + $0xf4] ss:$12 sps:$4 sm:$0xff]  }
 0x563   :  { %v1899_v45 = vpop.f32.mrf.mxu0  ;;  %v1814_v35 = vmul.f32 %v3320_v33, %v1795_v59  ;;  %v2658_v7 = vmul.f32 -1.442695, %v1902_v36  ;;  %v1909_v46 = vadd.f32 %v1858_v50, %v427_v57  ;;  %v3425_v59 = vld [vmem:[#allocation5 + $0xf0] ss:$12 sps:$4 sm:$0xff]   ;;  %v3428_v33 = vld [vmem:[#allocation5 + $0xd8] ss:$12 sps:$4 sm:$0xff]   ;;  %v2124_v50 = vpack.c.bf16 %v4230_v8, %v4070_v60 }
 0x564   :  { %v1860_v56 = vpop.f32.mrf.mxu1  ;;  %v3322_v51 = vpop.eup %3321  ;;  %v3427_v36 = vld [vmem:[#allocation5 + $0xdc] ss:$12 sps:$4 sm:$0xff]   ;;  %v3430_v38 = vld [vmem:[#allocation5 + $0xc4] ss:$12 sps:$4 sm:$0xff]   ;;  %v3431_v45 = vld [vmem:[#allocation5 + $0xc0] ss:$12 sps:$4 sm:$0xff]  }
 0x565   :  { %v3039_v49 = vpop.f32.mrf.mxu0  ;;  %v1815_v47 = vadd.f32 %v1814_v35, %v1713_v42  ;;  %3323 = vpow2.f32 %v2658_v7  ;;  %v2659_v44 = vmul.f32 -1.442695, %v1909_v46  ;;  %v1817_v30 = vsub.f32 1.0, %v3322_v51  ;;  %v3429_v42 = vld [vmem:[#allocation5 + $0xe0] ss:$12 sps:$4 sm:$0xff]   ;;  %v3253_v56 = vld [vmem:[%s4522_s7 + $0x38] sm:$0xff]  }
 0x566   :  { %v1819_v0 = vmul.f32 %v3322_v51, %v4230_v8  ;;  %v3432_v35 = vld [vmem:[#allocation5 + $0xc8] ss:$12 sps:$4 sm:$0xff]   ;;  %v3256_v60 = vld [vmem:[%s4522_s7 + $0x20] sm:$0xff]   ;;  %v3257_v8 = vld [vmem:[%s4522_s7 + $0x18] sm:$0xff]  }
 0x567   :  { %3325 = vtanh.f32 %v1815_v47  ;;  %v3255_v49 = vld [vmem:[%s4522_s7 + $0x28] sm:$0xff]   ;;  %v3258_v55 = vld [vmem:[%s4522_s7 + $0x10] sm:$0xff]   ;;  %v3260_v57 = vld [vmem:[%s4522_s7] sm:$0xff]  }
 0x568   :  { %3327 = vpow2.f32 %v2659_v44  ;;  %v3261_v47 = vld [vmem:[%s4524_s9 + $0x18] sm:$0xff]  }
 0x572   :  { %v3324_v52 = vpop.eup %3323 }
 0x573   :  { %v1906_v58 = vadd.f32 1.0, %v3324_v52 }
 0x574   :  { %v3326_v43 = vpop.eup %3325 }
 0x575   :  { %3329 = vrcp.f32 %v1906_v58  ;;  %v1818_v31 = vmul.f32 %v3326_v43, %v1817_v30  ;;  %v3328_v54 = vpop.eup %3327 }
 0x576   :  { %v1913_v61 = vadd.f32 1.0, %v3328_v54 }
 0x577   :  { %v4328_v14 = vadd.f32 %v1819_v0, %v1818_v31 }
 0x578   :  { %3331 = vrcp.f32 %v1913_v61 }
 0x579   :  { %v2005_v7 = vpack.c.bf16 %v4328_v14, %v4328_v14 }
 0x582   :  { %v3330_v41 = vpop.eup %3329 }
 0x583   :  { %v1916_v15 = vmul.f32 %v3330_v41, %v1897_v37 }
 0x585   :  { %v1917_v18 = vadd.f32 %v1916_v15, %v4716_v9  ;;  %v3332_v28 = vpop.eup %3331 }
 0x586   :  { %v1919_v11 = vsub.f32 1.0, %v3332_v28  ;;  %v1921_v29 = vmul.f32 %v3332_v28, %v4235_v48  ;;  %v3414_v48 = vld [vmem:[#allocation5 + $0x158] ss:$12 sps:$4 sm:$0xff]  }
 0x587   :  { %3333 = vtanh.f32 %v1917_v18 }
 0x594   :  { %v3334_v1 = vpop.eup %3333 }
 0x595   :  { %v1920_v27 = vmul.f32 %v3334_v1, %v1919_v11 }
 0x597   :  { %v1922_v23 = vadd.f32 %v1921_v29, %v1920_v27 }
 0x599   :  { %v1923_v20 = vpack.c.bf16 %v1922_v23, %v1922_v23 }
 0x59b   :  { %1957 = vmatmul.mubr.bf16.vlgmr.msra.gmra.mxu1 %v1923_v20  ;;  %3057 = vmatmul.mubr.bf16.vlgmr.msra.gmra.mxu0 %v1923_v20 }
 0x59c   :  { %2007 = vmatpush1.bf16.msra.mxu1 %v3410_v13  ;;  %3061 = vmatpush3.bf16.msra.mxu0 %v3411_v6 }
 0x59d   :  { %2008 = vmatprep.subr.bf16.mxu1 %v3412_v16  ;;  %3062 = vmatprep.subr.bf16.mxu0 %v4638_v12 }
 0x59e   :  { %2038 = vmatprep.mubr.bf16.mxu1 %v4639_v22  ;;  %3076 = vmatprep.mubr.msk.bf16.mxu0 %vm3504_vm0, %v4638_v12  ;;  %v3419_v22 = vld [vmem:[#allocation5 + $0x120] ss:$12 sps:$4 sm:$0xff]   ;;  %vm2523_vm0 = vcmask 0  }
 0x5a0   :  { %2009 = vmatpush1.bf16.msra.mxu1 %v3413_v17  ;;  %3063 = vmatpush3.bf16.msra.mxu0 %v3414_v48 }
 0x5a1   :  { %2010 = vmatprep.subr.bf16.mxu1 %v3415_v21  ;;  %3064 = vmatprep.subr.bf16.mxu0 %v4638_v12 }
 0x5a4   :  { %2011 = vmatpush1.bf16.msra.mxu1 %v3416_v24  ;;  %3065 = vmatpush3.bf16.msra.mxu0 %v3417_v19 }
 0x5a5   :  { %2012 = vmatprep.subr.bf16.mxu1 %v3418_v4  ;;  %3066 = vmatprep.subr.bf16.mxu0 %v4638_v12 }
 0x5a8   :  { %2013 = vmatpush1.bf16.msra.mxu1 %v3419_v22  ;;  %3067 = vmatpush3.bf16.msra.mxu0 %v3420_v10 }
 0x5a9   :  { %2014 = vmatprep.subr.bf16.mxu1 %v3421_v26  ;;  %3068 = vmatprep.subr.bf16.mxu0 %v4638_v12 }
 0x5ac   :  { %2015 = vmatpush1.bf16.msra.mxu1 %v3422_v2  ;;  %3069 = vmatpush3.bf16.msra.mxu0 %v3423_v5  ;;  %v3264_v5 = vld [vmem:[%s4524_s9] sm:$0xff]  }
 0x5ad   :  { %2016 = vmatprep.subr.bf16.mxu1 %v3424_v34  ;;  %3070 = vmatprep.subr.bf16.mxu0 %v4638_v12 }
 0x5b0   :  { %2017 = vmatpush1.bf16.msra.mxu1 %v3425_v59  ;;  %3071 = vmatpush3.bf16.msra.mxu0 %v3426_v62  ;;  %v2662_v59 = vld [vmem:[%s4523_s8] ss:$0 sm:$0xff]  ;;  %s3477_s8 = scalar_lea.vmem %s2534_s5, 32 }
 0x5b1   :  { %2018 = vmatprep.subr.bf16.mxu1 %v3427_v36  ;;  %3072 = vmatprep.subr.bf16.mxu0 %v4638_v12  ;;  %p3479_p12 = scmp.lt.s32.totalorder %s3477_s8, %s3473_s4 }
 0x5b3   :  { %p3480_p13 = por %p3479_p12, %p3478_p11 }
 0x5b4   :  { %2019 = vmatpush1.bf16.msra.mxu1 %v3428_v33  ;;  %3073 = vmatpush3.bf16.msra.mxu0 %v3429_v42 }
 0x5b5   :  { %2020 = vmatprep.subr.bf16.mxu1 %v3430_v38  ;;  %3074 = vmatprep.subr.bf16.mxu0 %v4638_v12  ;;  %v3254_v12 = vld [vmem:[%s4522_s7 + $0x30] sm:$0xff]   ;;  %p3481_p0 = pnand %p3480_p13, %p3474_p10 }
 0x5b8   :  { %2021 = vmatpush1.bf16.msra.mxu1 %v3431_v45  ;;  %3075 = vmatpush3.bf16.msra.mxu0 %v3432_v35 }
 0x5b9   :  { %3080 = vmatprep.subr.bf16.mxu1 %v3253_v56  ;;  %3100 = vmatprep.subr.bf16.mxu0 %v3261_v47 }
 0x5bb   :  { %2039 = vmatmul.mubr.bf16.vlgmr.msra.gmra.mxu1 %v2005_v7  ;;  %3077 = vmatmul.mubr.bf16.vlgmr.msra.gmra.mxu0 %v2005_v7 }
 0x5bc   :  { %3096 = vmatprep.mubr.bf16.mxu1 %v2124_v50  ;;  %3081 = vmatpush3.bf16.msra.mxu1 %v3253_v56 }
 0x5bd   :  { %3082 = vmatprep.subr.bf16.mxu1 %v3254_v12  ;;  %3101 = vmatpush3.bf16.msra.mxu0 %v3261_v47 }
 0x5c0   :  { %3083 = vmatpush3.bf16.msra.mxu1 %v3254_v12 }
 0x5c1   :  { %3084 = vmatprep.subr.bf16.mxu1 %v3255_v49 }
 0x5c4   :  { %3085 = vmatpush3.bf16.msra.mxu1 %v3255_v49 }
 0x5c5   :  { %3086 = vmatprep.subr.bf16.mxu1 %v3256_v60 }
 0x5c8   :  { %3087 = vmatpush3.bf16.msra.mxu1 %v3256_v60  ;;  %v2671_v60 = vld [vmem:[%s4525_s10] ss:$0 sm:$0xff] }
 0x5c9   :  { %3088 = vmatprep.subr.bf16.mxu1 %v3257_v8 }
 0x5cc   :  { %3089 = vmatpush3.bf16.msra.mxu1 %v3257_v8 }
 0x5cd   :  { %3090 = vmatprep.subr.bf16.mxu1 %v3258_v55 }
 0x5d0   :  { %3091 = vmatpush3.bf16.msra.mxu1 %v3258_v55 }
 0x5d1   :  { %3092 = vmatprep.subr.bf16.mxu1 %v3259_v3 }
 0x5d4   :  { %3093 = vmatpush3.bf16.msra.mxu1 %v3259_v3 }
 0x5d5   :  { %3094 = vmatprep.subr.bf16.mxu1 %v3260_v57 }
 0x5d8   :  { %3095 = vmatpush3.bf16.msra.mxu1 %v3260_v57 }
 0x65b   :  { %v1958_v46 = vpop.f32.mrf.mxu1  ;;  %v1999_v44 = vpop.f32.mrf.mxu0 }
 0x65c   :  { %v1959_v61 = vadd.f32 %v1958_v46, %v4710_v39  ;;  %v2000_v21 = vadd.f32 %v1999_v44, %v4061_v32  ;;  %v3263_v32 = vld [vmem:[%s4524_s9 + $0x8] sm:$0xff]  }
 0x65d   :  { %v1960_v51 = vpop.f32.mrf.mxu1  ;;  %v3058_v52 = vpop.f32.mrf.mxu0 }
 0x65e   :  { %v1961_v23 = vadd.f32 %v1960_v51, %v4048_v40 }
 0x65f   :  { %v1962_v58 = vpop.f32.mrf.mxu1  ;;  %v2002_v30 = vpop.f32.mrf.mxu0 }
 0x661   :  { %v1963_v43 = vpop.f32.mrf.mxu1  ;;  %v3059_v31 = vpop.f32.mrf.mxu0 }
 0x662   :  { %v2419_v31 = vld [vmem:[%s4527_s12 + $0x8] sm:$0xff] }
 0x67b   :  { %v2040_v0 = vpop.f32.mrf.mxu1  ;;  %v2081_v54 = vpop.f32.mrf.mxu0 }
 0x67c   :  { %v2041_v37 = vadd.f32 %v2040_v0, %v4711_v25  ;;  %v2082_v17 = vadd.f32 %v2081_v54, %v4712_v63  ;;  %v3262_v63 = vld [vmem:[%s4524_s9 + $0x10] sm:$0xff]   ;;  %v2418_v54 = vld [vmem:[%s4527_s12] sm:$0xff] }
 0x67d   :  { %v2042_v41 = vpop.f32.mrf.mxu1  ;;  %v3078_v15 = vpop.f32.mrf.mxu0  ;;  %3102 = vmatprep.subr.bf16.mxu0 %v3262_v63  ;;  %v2420_v0 = vld [vmem:[%s4527_s12 + $0x10] sm:$0xff] }
 0x67e   :  { %v2087_v9 = vadd.f32 %v2041_v37, %v1959_v61  ;;  %v2043_v1 = vadd.f32 %v2042_v41, %v4701_v53  ;;  %3103 = vmatpush3.bf16.msra.mxu0 %v3262_v63  ;;  %v2421_v61 = vld [vmem:[%s4527_s12 + $0x18] sm:$0xff] }
 0x67f   :  { %v2044_v18 = vpop.f32.mrf.mxu1  ;;  %v2084_v28 = vpop.f32.mrf.mxu0  ;;  %3104 = vmatprep.subr.bf16.mxu0 %v3263_v32 }
 0x680   :  { %v2660_v11 = vmul.f32 -1.442695, %v2087_v9  ;;  %v2094_v20 = vadd.f32 %v2043_v1, %v1961_v23 }
 0x681   :  { %v2045_v27 = vpop.f32.mrf.mxu1  ;;  %v3079_v29 = vpop.f32.mrf.mxu0 }
 0x682   :  { %3335 = vpow2.f32 %v2660_v11  ;;  %v2661_v13 = vmul.f32 -1.442695, %v2094_v20  ;;  %3105 = vmatpush3.bf16.msra.mxu0 %v3263_v32 }
 0x683   :  { %3106 = vmatprep.subr.bf16.mxu0 %v3264_v5 }
 0x684   :  { %3337 = vpow2.f32 %v2661_v13 }
 0x686   :  { %3107 = vmatpush3.bf16.msra.mxu0 %v3264_v5 }
 0x68f   :  { %v3336_v6 = vpop.eup %3335 }
 0x690   :  { %v2091_v39 = vadd.f32 1.0, %v3336_v6 }
 0x691   :  { %v3338_v25 = vpop.eup %3337 }
 0x692   :  { %3339 = vrcp.f32 %v2091_v39  ;;  %v2098_v16 = vadd.f32 1.0, %v3338_v25  ;;  %v4717_v39 = vlaneseq }
 0x694   :  { %3341 = vrcp.f32 %v2098_v16  ;;  %v2332_v25 = vand.u32 127, %v4717_v39  ;;  %v2494_v39 = vld [vmem:[%s4528_s13] sm:$0xff] }
 0x69f   :  { %v3340_v48 = vpop.eup %3339 }
 0x6a0   :  { %v2101_v24 = vmul.f32 %v3340_v48, %v2082_v17 }
 0x6a1   :  { %v3342_v19 = vpop.eup %3341 }
 0x6a2   :  { %v2102_v53 = vadd.f32 %v2101_v24, %v2000_v21  ;;  %v2104_v40 = vsub.f32 1.0, %v3342_v19  ;;  %v2106_v10 = vmul.f32 %v3342_v19, %v4328_v14 }
 0x6a4   :  { %3343 = vtanh.f32 %v2102_v53 }
 0x6b1   :  { %v3344_v4 = vpop.eup %3343 }
 0x6b2   :  { %v2105_v22 = vmul.f32 %v3344_v4, %v2104_v40 }
 0x6b4   :  { %v2107_v26 = vadd.f32 %v2106_v10, %v2105_v22 }
 0x6b6   :  { %v2125_v2 = vpack.c.bf16 %v2107_v26, %v4328_v14 }
 0x6b8   :  { %3097 = vmatmul.mubr.bf16.vlgmr.msra.gmra.mxu1 %v2125_v2 }
 0x778   :  { %v3098_v14 = vpop.f32.mrf.mxu1 }
 0x779   :  { %v2224_v42 = vadd.f32 %v3098_v14, %v2662_v59 }
 0x77a   :  { %v2215_v34 = vpop.f32.mrf.mxu1 }
 0x77b   :  { %v2216_v36 = vadd.f32 %v2662_v59, %v2215_v34  ;;  %v2232_v56 = vmax.f32 %v2224_v42, 0.0 }
 0x77c   :  { %v3099_v62 = vpop.f32.mrf.mxu1 }
 0x77d   :  { %v2227_v33 = vadd.f32 %v3099_v62, %v2662_v59  ;;  %v2230_v7 = vmax.f32 %v2216_v36, 0.0 }
 0x77e   :  { %v2218_v38 = vpop.f32.mrf.mxu1 }
 0x77f   :  { %v2219_v45 = vadd.f32 %v2662_v59, %v2218_v38  ;;  %v2233_v35 = vmax.f32 %v2227_v33, 0.0 }
 0x781   :  { %v2231_v50 = vmax.f32 %v2219_v45, 0.0  ;;  %v2243_v49 = vpack.c.bf16 %v2233_v35, %v2232_v56 }
 0x783   :  { %v2242_v12 = vpack.c.bf16 %v2231_v50, %v2230_v7 }
 0x785   :  { %3108 = vmatprep.mubr.msk.bf16.mxu0 %vm2275_vm2, %v2242_v12 }
 0x786   :  { %3109 = vmatmul.mubr.msk.bf16.vlgmr.msra.gmra.mxu0 %vm2275_vm2, %v2243_v49 }
 0x846   :  { %v3110_v8 = vpop.f32.mrf.mxu0 }
 0x847   :  { %v2325_v55 = vadd.f32 %v3110_v8, %v2671_v60 }
 0x848   :  { %v2316_v3 = vpop.f32.mrf.mxu0 }
 0x849   :  { %v4397_v57 = vadd.f32 %v2671_v60, %v2316_v3  ;;  %v2339_v47 = vsel %vm96_vm1, %v2325_v55, -inf }
 0x84a   :  { %2340 = vmax.xlane.f32.xlu1 %v2339_v47  ;;  %v3111_v46 = vpop.f32.mrf.mxu0 }
 0x84b   :  { %v4400_v44 = vadd.f32 %v3111_v46, %v2671_v60  ;;  %v2333_v51 = vsel %vm96_vm1, %v4397_v57, -inf }
 0x84c   :  { %v2319_v52 = vpop.f32.mrf.mxu0  ;;  %2334 = vmax.xlane.f32.xlu0 %v2333_v51 }
 0x84d   :  { %v4404_v58 = vadd.f32 %v2671_v60, %v2319_v52  ;;  %v2342_v30 = vsel %vm96_vm1, %v4400_v44, -inf }
 0x84e   :  { %2343 = vmax.xlane.f32.xlu1 %v2342_v30 }
 0x84f   :  { %v2336_v43 = vsel %vm96_vm1, %v4404_v58, -inf }
 0x850   :  { %2337 = vmax.xlane.f32.xlu0 %v2336_v43 }
 0x85f   :  { %2426 = vperm.xlu1 %3123, %v2419_v31  }
 0x863   :  { %2429 = vperm.xlu1 %3123, %v2420_v0  }
 0x866   :  { %2423 = vperm.xlu0 %3122, %v2418_v54  }
 0x867   :  { %2432 = vperm.xlu1 %3123, %v2421_v61  }
 0x8d3   :  { %v4422_v37 = vpop.xlane.xlu1 %2340 }
 0x8d4   :  { %v2440_v41 = vsub.f32 %v2325_v55, %v4422_v37  ;;  %vm2347_vm4 = vcmp.eq.f32.partialorder %v2325_v55, %v4422_v37 }
 0x8d5   :  { %v4425_v15 = vpop.xlane.xlu0 %2334  ;;  %v2351_v26 = vsel %vm2347_vm4, %v2332_v25, 16 }
 0x8d6   :  { %v2438_v9 = vsub.f32 %v4397_v57, %v4425_v15  ;;  %v2446_v28 = vmul.f32 1.442695, %v2440_v41  ;;  %vm2345_vm3 = vcmp.eq.f32.partialorder %v4397_v57, %v4425_v15  ;;  %v2383_v5 = vsel %vm96_vm1, %v2351_v26, 2147483647 }
 0x8d7   :  { %v4429_v18 = vpop.xlane.xlu1 %2343  ;;  %v2349_v21 = vsel %vm2345_vm3, %v2332_v25, 16  ;;  %v2385_v62 = vshra.s32 %v2383_v5, 16  ;;  %v2384_v43 = vand.u32 65535, %v2383_v5 }
 0x8d8   :  { %v2442_v11 = vmul.f32 1.442695, %v2438_v9  ;;  %v2441_v1 = vsub.f32 %v4400_v44, %v4429_v18  ;;  %v2353_v4 = vsel %vm96_vm1, %v2349_v21, 2147483647  ;;  %vm2348_vm9 = vcmp.eq.f32.partialorder %v4400_v44, %v4429_v18  ;;  %v2495_v21 = vld [vmem:[%s4528_s13 + $0x8] sm:$0xff] }
 0x8d9   :  { %v4433_v27 = vpop.xlane.xlu0 %2337  ;;  %v2355_v2 = vshra.s32 %v2353_v4, 16  ;;  %v2387_v38 = vcvt.s32.f32 %v2385_v62  ;;  %v2352_v50 = vsel %vm2348_vm9, %v2332_v25, 16  ;;  %v2354_v51 = vand.u32 65535, %v2353_v4 }
 0x8da   :  { %3345 = vpow2.f32 %v2442_v11  ;;  %v2439_v29 = vsub.f32 %v4404_v58, %v4433_v27  ;;  %v2448_v23 = vmul.f32 1.442695, %v2441_v1  ;;  %vm2346_vm7 = vcmp.eq.f32.partialorder %v4404_v58, %v4433_v27 }
 0x8db   :  { %3347 = vpow2.f32 %v2446_v28  ;;  %v2427_v13 = vpop.permute.xlu1 %2426  ;;  %v2357_v59 = vcvt.s32.f32 %v2355_v2  ;;  %v2350_v42 = vsel %vm2346_vm7, %v2332_v25, 16  ;;  %v4463_v49 = vsel %vm96_vm1, %v2352_v50, 2147483647 }
 0x8dc   :  { %v2444_v20 = vmul.f32 1.442695, %v2439_v29  ;;  %vm2435_vm8 = vcmp.eq.s32.totalorder %v2332_v25, %v2427_v13  ;;  %v4457_v35 = vsel %vm96_vm1, %v2350_v42, 2147483647  ;;  %v2400_v8 = vshra.s32 %v4463_v49, 16 }
 0x8dd   :  { %v2475_v33 = vsel %vm2435_vm8, %v4404_v58, 0.0  ;;  %v2370_v56 = vshra.s32 %v4457_v35, 16  ;;  %v2356_v30 = vcvt.s32.f32 %v2354_v51  ;;  %v2386_v41 = vcvt.s32.f32 %v2384_v43 }
 0x8de   :  { %3349 = vpow2.f32 %v2444_v20  ;;  %v2481_v45 = vsel %vm96_vm1, %v2475_v33, 0.0  ;;  %v2399_v33 = vand.u32 65535, %v4463_v49 }
 0x8df   :  { %3351 = vpow2.f32 %v2448_v23  ;;  %v2430_v16 = vpop.permute.xlu1 %2429  ;;  %v4465_v60 = vcvt.s32.f32 %v2370_v56 }
 0x8e0   :  { %vm2436_vm5 = vcmp.eq.s32.totalorder %v2332_v25, %v2430_v16 }
 0x8e1   :  { %v2424_v53 = vpop.permute.xlu0 %2423  ;;  %v2476_v10 = vsel %vm2436_vm5, %v2325_v55, 0.0  ;;  %v4469_v55 = vcvt.s32.f32 %v2400_v8 }
 0x8e2   :  { %vm2434_vm6 = vcmp.eq.s32.totalorder %v2332_v25, %v2424_v53  ;;  %v2484_v32 = vsel %vm96_vm1, %v2476_v10, 0.0 }
 0x8e3   :  { %v2474_v14 = vsel %vm2434_vm6, %v4397_v57, 0.0  ;;  %v2433_v34 = vpop.permute.xlu1 %2432 }
 0x8e4   :  { %v2478_v36 = vsel %vm96_vm1, %v2474_v14, 0.0  ;;  %vm2437_vm10 = vcmp.eq.s32.totalorder %v2332_v25, %v2433_v34 }
 0x8e5   :  { %v2477_v7 = vsel %vm2437_vm10, %v4400_v44, 0.0 }
 0x8e6   :  { %v2487_v12 = vsel %vm96_vm1, %v2477_v7, 0.0 }
 0x8e7   :  { %v3346_v6 = vpop.eup %3345 }
 0x8e8   :  { %v2450_v17 = vsel %vm96_vm1, %v3346_v6, 0.0  ;;  %v3348_v48 = vpop.eup %3347 }
 0x8e9   :  { %2451 = vadd.xlane.f32.xlu1 %v2450_v17  ;;  %v2456_v19 = vsel %vm96_vm1, %v3348_v48, 0.0 }
 0x8eb   :  { %v3350_v24 = vpop.eup %3349 }
 0x8ec   :  { %v2453_v40 = vsel %vm96_vm1, %v3350_v24, 0.0  ;;  %v3352_v22 = vpop.eup %3351 }
 0x8ed   :  { %2457 = vadd.xlane.f32.xlu1 %v2456_v19  ;;  %2454 = vadd.xlane.f32.xlu0 %v2453_v40  ;;  %v2459_v63 = vsel %vm96_vm1, %v3352_v22, 0.0 }
 0x8f1   :  { %2460 = vadd.xlane.f32.xlu1 %v2459_v63  ;;  %2485 = vadd.xlane.f32.xlu0 %v2484_v32 }
 0x8f5   :  { %2358 = vmin.xlane.f32.xlu0 %v2357_v59  ;;  %2479 = vadd.xlane.f32.xlu1 %v2478_v36 }
 0x8f9   :  { %2388 = vmin.xlane.f32.xlu0 %v2387_v38  ;;  %2482 = vadd.xlane.f32.xlu1 %v2481_v45 }
 0x8fd   :  { %2488 = vadd.xlane.f32.xlu1 %v2487_v12 }
 0x901   :  { %2373 = vmin.xlane.f32.xlu1 %v4465_v60 }
 0x905   :  { %2403 = vmin.xlane.f32.xlu1 %v4469_v55 }
 0x972   :  { %v2452_v3 = vpop.xlane.xlu1 %2451 }
 0x973   :  { %3353 = vlog2.f32 %v2452_v3 }
 0x976   :  { %v2458_v57 = vpop.xlane.xlu1 %2457  ;;  %v2455_v47 = vpop.xlane.xlu0 %2454 }
 0x977   :  { %3355 = vlog2.f32 %v2458_v57 }
 0x978   :  { %3357 = vlog2.f32 %v2455_v47 }
 0x97a   :  { %v2461_v46 = vpop.xlane.xlu1 %2460  ;;  %v2486_v44 = vpop.xlane.xlu0 %2485 }
 0x97b   :  { %3359 = vlog2.f32 %v2461_v46 }
 0x97e   :  { %v2480_v52 = vpop.xlane.xlu1 %2479  ;;  %v2359_v58 = vpop.xlane.xlu0 %2358 }
 0x97f   :  { %vm2360_vm11 = vcmp.eq.f32.partialorder %v2357_v59, %v2359_v58  ;;  %v2365_v7 = vcvt.f32.s32 %v2359_v58 }
 0x980   :  { %v3354_v31 = vpop.eup %3353  ;;  %v2361_v0 = vsel %vm2360_vm11, %v2356_v30, inf }
 0x981   :  { %v2463_v54 = vmul.f32 0.6931472, %v3354_v31  ;;  %2362 = vmin.xlane.f32.xlu1 %v2361_v0  ;;  %v2366_v56 = vshll.u32 %v2365_v7, 16 }
 0x982   :  { %v2389_v61 = vpop.xlane.xlu0 %2388  ;;  %v2483_v11 = vpop.xlane.xlu1 %2482 }
 0x983   :  { %v2470_v9 = vadd.f32 %v2463_v54, %v4425_v15  ;;  %vm2390_vm12 = vcmp.eq.f32.partialorder %v2387_v38, %v2389_v61  ;;  %v2496_v15 = vld [vmem:[%s4528_s13 + $0x10] sm:$0xff]  ;;  %v2401_v38 = vcvt.s32.f32 %v2399_v33  ;;  %v2395_v12 = vcvt.f32.s32 %v2389_v61 }
 0x984   :  { %v3356_v28 = vpop.eup %3355  ;;  %v2391_v1 = vsel %vm2390_vm12, %v2386_v41, inf }
 0x985   :  { %v3358_v29 = vpop.eup %3357  ;;  %v2467_v23 = vmul.f32 0.6931472, %v3356_v28  ;;  %2392 = vmin.xlane.f32.xlu1 %v2391_v1  ;;  %v2490_v13 = vsub.f32 %v2470_v9, %v2480_v52  ;;  %v2396_v57 = vshll.u32 %v2395_v12, 16 }
 0x986   :  { %v2465_v20 = vmul.f32 0.6931472, %v3358_v29 }
 0x987   :  { %v2472_v6 = vadd.f32 %v2467_v23, %v4422_v37  ;;  %v2498_v24 = vmul.f32 %v2494_v39, %v2490_v13  ;;  %v2489_v37 = vpop.xlane.xlu1 %2488 }
 0x988   :  { %v3360_v25 = vpop.eup %3359  ;;  %v2471_v16 = vadd.f32 %v2465_v20, %v4433_v27  ;;  %v2497_v27 = vld [vmem:[%s4528_s13 + $0x18] sm:$0xff] }
 0x989   :  { %v2469_v17 = vmul.f32 0.6931472, %v3360_v25  ;;  %v2492_v48 = vsub.f32 %v2472_v6, %v2486_v44  ;;  %v2502_v10 = vsel %vm2413_vm13, %v2498_v24, 0.0 }
 0x98a   :  { %v2491_v53 = vsub.f32 %v2471_v16, %v2483_v11 }
 0x98b   :  { %v2473_v19 = vadd.f32 %v2469_v17, %v4429_v18  ;;  %v2500_v40 = vmul.f32 %v2496_v15, %v2492_v48  ;;  %v2374_v32 = vpop.xlane.xlu1 %2373  ;;  %v2369_v18 = vand.u32 65535, %v4457_v35 }
 0x98c   :  { %v2499_v4 = vmul.f32 %v2495_v21, %v2491_v53  ;;  %vm2375_vm14 = vcmp.eq.f32.partialorder %v4465_v60, %v2374_v32  ;;  %v2380_v47 = vcvt.f32.s32 %v2374_v32 }
 0x98d   :  { %v2493_v22 = vsub.f32 %v2473_v19, %v2489_v37  ;;  %v2505_v5 = vsel %vm2413_vm13, %v2500_v40, 0.0  ;;  %v2371_v36 = vcvt.s32.f32 %v2369_v18 }
 0x98e   :  { %v2503_v26 = vsel %vm2413_vm13, %v2499_v4, 0.0  ;;  %v2381_v52 = vshll.u32 %v2380_v47, 16 }
 0x98f   :  { %v2501_v2 = vmul.f32 %v2497_v27, %v2493_v22  ;;  %v2504_v63 = vadd.f32 %v2503_v26, %v2502_v10  ;;  %v2404_v62 = vpop.xlane.xlu1 %2403  ;;  %v2376_v42 = vsel %vm2375_vm14, %v2371_v36, inf }
 0x990   :  { %vm2405_vm15 = vcmp.eq.f32.partialorder %v4469_v55, %v2404_v62  ;;  %v2410_v58 = vcvt.f32.s32 %v2404_v62 }
 0x991   :  { %v2506_v14 = vadd.f32 %v2505_v5, %v2504_v63  ;;  %v2507_v34 = vsel %vm2413_vm13, %v2501_v2, 0.0  ;;  %v2406_v45 = vsel %vm2405_vm15, %v2401_v38, inf }
 0x992   :  { %v2411_v61 = vshll.u32 %v2410_v58, 16 }
 0x993   :  { %v2508_v59 = vadd.f32 %v2507_v34, %v2506_v14 }
 0x995   :  { %2509 = vadd.xlane.f32.xlu0 %v2508_v59 }
 0x999   :  { %2377 = vmin.xlane.f32.xlu0 %v2376_v42 }
 0x99d   :  { %2407 = vmin.xlane.f32.xlu0 %v2406_v45 }
 0xa0a   :  { %v2363_v50 = vpop.xlane.xlu1 %2362 }
 0xa0b   :  { %v2364_v35 = vcvt.f32.s32 %v2363_v50 }
 0xa0d   :  { %v2367_v8 = vadd.s32 %v2366_v56, %v2364_v35 }
 0xa0e   :  { %v2393_v3 = vpop.xlane.xlu1 %2392 }
 0xa0f   :  { %2414 = vst.msk [vmem:[%s4529_s14] sm:$0xff] %vm2413_vm13, %v2367_v8  ;;  %v2394_v49 = vcvt.f32.s32 %v2393_v3 }
 0xa11   :  { %v2397_v60 = vadd.s32 %v2396_v57, %v2394_v49 }
 0xa13   :  { %2416 = vst.msk [vmem:[%s4529_s14 + $0x10] sm:$0xff] %vm2413_vm13, %v2397_v60 }
 0xa1e   :  { %v2510_v55 = vpop.xlane.xlu0 %2509 }
 0xa1f   :  { %v2511_v46 = vrot.slane %v2510_v55, 4 }
 0xa21   :  { %v2512_v44 = vadd.f32 %v2511_v46, %v2510_v55 }
 0xa22   :  { %v2378_v51 = vpop.xlane.xlu0 %2377 }
 0xa23   :  { %v2513_v30 = vrot.slane %v2512_v44, 2  ;;  %v2379_v43 = vcvt.f32.s32 %v2378_v51 }
 0xa25   :  { %v2382_v31 = vadd.s32 %v2381_v52, %v2379_v43  ;;  %v2514_v0 = vadd.f32 %v2513_v30, %v2512_v44 }
 0xa26   :  { %v2408_v54 = vpop.xlane.xlu0 %2407 }
 0xa27   :  { %2415 = vst.msk [vmem:[%s4529_s14 + $0x8] sm:$0xff] %vm2413_vm13, %v2382_v31  ;;  %v2409_v41 = vcvt.f32.s32 %v2408_v54  ;;  %v2515_v9 = vrot.slane %v2514_v0, 1 }
 0xa29   :  { %v2412_v28 = vadd.s32 %v2411_v61, %v2409_v41  ;;  %v2516_v11 = vadd.f32 %v2515_v9, %v2514_v0 }
 0xa2b   :  { %2417 = vst.msk [vmem:[%s4529_s14 + $0x18] sm:$0xff] %vm2413_vm13, %v2412_v28 }
 0xa2c   :  { %3112 = vpush %v2516_v11 }
 0xa5d   :  { %s3113_s6 = spop %3112 }
 0xa5e   :  { %s2520_s9 = smul.f32 0.125, %s3113_s6 }
 0xa60   :  { %v2521_v1 = vstv %s2520_s9 }
 0xa61   :  { %2524 = vst.msk [vmem:[#allocation7] sm:$0x1] %vm2523_vm0, %v2521_v1 }
 0xa62   :  { %3484 = shalt.err (!%p3481_p0)
}
 0xa63   :  { %2536 = dma.vmem_to_hbm [thread:$0]  %s2534_s5, 16, %s4530_s15, [#allocation4]  }
 0xa64   :  { %3497 = dma.done.wait [#allocation4], 16  }
 0xa65   :  { %3498 = vsyncadd [#allocation4], 4294967280 }
 0xa66   :  { %2542 = vsyncpa [#allocation3], 1 }
 0xa67   :  { %2543 = vsyncpa [#allocation6], 1 }
 0xa68   :  { %2544 = vsyncpa [#allocation4], 1 }

</bundles_post_ra>
